<compile_context>
chip_gen: v5e
topology: v5e:2x2
jax: 0.10.0
libtpu: 0.0.40
codegen_flags: <defaults>
</compile_context>

<pallas_src>
import functools

import jax
import jax.numpy as jnp
from jax.experimental import pallas as pl
from jax.experimental.pallas import tpu as pltpu


# --------------------------------------------------------------------------------------- kernel

def f3fn_kernel(spec_ref, spat_ref,
                wc1_ref, bc1_ref, wc2_ref, bc2_ref,
                wbr_s_ref, wbr_p_ref, bbr_ref,
                wfu_ref, bfu_ref,
                wd1_ref, bd1_ref, wd2_ref, bd2_ref,
                emb_ref, out_ref):
    """One batch tile. All matmuls are bf16 x bf16 -> f32 accumulation on the MXU; biases and the
    stored embedding stay f32; each activation is cast to bf16 exactly once (one VPU pass)."""

    def mm(x, w_ref):
        return jnp.dot(x, w_ref[...], preferred_element_type=jnp.float32)

    def relu_bf16(y_f32):
        # bias-add / ReLU in f32 (v5e has no bf16 VALU), single cast for the next MXU operand.
        return jnp.maximum(y_f32, 0.0).astype(jnp.bfloat16)

    # Spectral branch: Conv1d(1->C1, k3, pad=1) as ONE banded matmul (padding folded into weight).
    conv_s = relu_bf16(mm(spec_ref[...], wc1_ref) + bc1_ref[...])      # (TB, L*C1)   lane-dense
    # Spatial branch: Conv2d(Cs->C2, 3x3, pad=1) as ONE banded matmul.
    conv_p = relu_bf16(mm(spat_ref[...], wc2_ref) + bc2_ref[...])      # (TB, H*W*C2) lane-dense

    # Merged branch FCs: global-avg-pool folded into the weights, spectral/spatial halves packed
    # into one N=2*branch=128 lane-dense output -> 2 matmuls instead of 4 narrow (N=64) ones.
    h_both = relu_bf16(mm(conv_s, wbr_s_ref) + mm(conv_p, wbr_p_ref) + bbr_ref[...])   # (TB, 128)

    # Fusion FC -> embedding (the concat is already realized by the merged layout above).
    emb = mm(h_both, wfu_ref) + bfu_ref[...]                           # (TB, emb) f32
    emb_ref[...] = emb.astype(emb_ref.dtype)

    # Decoder head: out = classifier(relu(embedding)).
    h = relu_bf16(mm(relu_bf16(emb), wd1_ref) + bd1_ref[...])
    out_ref[...] = (mm(h, wd2_ref) + bd2_ref[...]).astype(out_ref.dtype)


# ------------------------------------------------------------------------------- weight packing

def pack_params(params, L, H, W, mm_dtype=jnp.bfloat16):
    """One-time weight repack (call ONCE at model init, NOT per forward):
      * conv weights -> banded matmul weights with the 'same' zero padding folded in,
      * global-average pools folded into the following FC weights,
      * the two branch FCs merged into a single lane-dense N=2*branch output,
      * matmul operands cast to bf16, biases kept f32."""
    (w1d, b1d, w2d, b2d, w_sfc, b_sfc, w_pfc, b_pfc,
     w_fuse, b_fuse, w_d1, b_d1, w_d2, b_d2) = params
    C1 = w1d.shape[1]
    _, _, Cs, C2 = w2d.shape
    branch = w_sfc.shape[1]

    # Spectral Conv1d(1->C1, k=3, pad=1) as a banded (L, L*C1) weight.
    d = jnp.arange(L)[:, None] - jnp.arange(L)[None, :] + 1             # tap index (l_in, l_out)
    v1 = ((d >= 0) & (d < 3)).astype(w1d.dtype)
    wc1 = (w1d[jnp.clip(d, 0, 2)] * v1[..., None]).reshape(L, L * C1)
    bc1 = jnp.tile(b1d, (1, L))                                         # (1, L*C1)

    # Spatial Conv2d(Cs->C2, 3x3, pad=1) as a banded (Cs*H*W, H*W*C2) weight (consumes NCHW flat).
    # NOTE(v7x): wc2 scales as (H*W)^2*Cs*C2 (~86% zeros). At 8x8/Cs=4 it is 512 KiB bf16 and fits
    # resident; for much larger patches switch to 9 per-tap matmuls over pltpu.roll-shifted views
    # or K-tile wc2 over an extra "arbitrary" grid axis.
    dh = jnp.arange(H)[:, None] - jnp.arange(H)[None, :] + 1            # (h_in, h_out)
    dw = jnp.arange(W)[:, None] - jnp.arange(W)[None, :] + 1            # (w_in, w_out)
    v2 = (((dh >= 0) & (dh < 3))[:, :, None, None]
          & ((dw >= 0) & (dw < 3))[None, None, :, :]).astype(w2d.dtype)
    K = w2d[jnp.clip(dh, 0, 2)[:, :, None, None],
            jnp.clip(dw, 0, 2)[None, None, :, :]]                       # (Hin,Hout,Win,Wout,Cs,C2)
    K = K * v2[..., None, None]
    K = jnp.transpose(K, (4, 0, 2, 1, 3, 5))                            # (Cs,Hin,Win,Hout,Wout,C2)
    wc2 = K.reshape(Cs * H * W, H * W * C2)
    bc2 = jnp.tile(b2d, (1, H * W))                                     # (1, H*W*C2)

    # Mean-pool folded into the branch FCs; spectral/spatial halves merged into ONE N=2*branch
    # output (zero-padded halves) so the branch activation is a full 128-lane tile.
    wsp = jnp.tile(w_sfc, (L, 1)) * (1.0 / L)                           # (L*C1,   branch)
    wpp = jnp.tile(w_pfc, (H * W, 1)) * (1.0 / (H * W))                 # (H*W*C2, branch)
    wbr_s = jnp.concatenate([wsp, jnp.zeros_like(wsp)], axis=1)         # (L*C1,   2*branch)
    wbr_p = jnp.concatenate([jnp.zeros_like(wpp), wpp], axis=1)         # (H*W*C2, 2*branch)
    bbr = jnp.concatenate([b_sfc, b_pfc], axis=1)                       # (1, 2*branch)

    c = lambda w: w.astype(mm_dtype)
    return (c(wc1), bc1, c(wc2), bc2, c(wbr_s), c(wbr_p), bbr,
            c(w_fuse), b_fuse, c(w_d1), b_d1, c(w_d2), b_d2)


# -------------------------------------------------------------------------------------- wrapper

_PER_ROW_VMEM = 16 * 1024   # ~bytes of VMEM per batch row (I/O double buffers + intermediates)


def _vmem_limit_bytes():
    phys = 64 * 1024 * 1024                       # conservative default (v7x per-TC VMEM)
    try:
        phys = int(getattr(pltpu.get_tpu_info(), "vmem_capacity_bytes", phys))
    except Exception:
        pass
    # ~75% of physical, floor 32 MiB, cap 100 MiB  (v7x -> ~48 MiB, v5e/v6e -> ~96 MiB).
    return int(min(max(32 * 1024 * 1024, 0.75 * phys), 100 * 1024 * 1024))


def f3fn_forward(spectral, space, packed, *, block_b=512):
    """spectral: (B, L) f32; space: (B, Cs, H, W) f32 (PyTorch NCHW); packed = pack_params(...).
    Returns (embedding (B, emb) f32, out (B, n_cls) f32)."""
    B, L = spectral.shape
    _, Cs, H, W = space.shape
    emb_dim = packed[8].shape[1]     # b_fuse: (1, emb)
    n_cls = packed[12].shape[1]      # b_d2:   (1, n_cls)
    in_dtype = packed[0].dtype       # matmul dtype (bf16)

    vmem_limit = _vmem_limit_bytes()
    # Resident weights (worst case double-buffered even with a constant index_map).
    weight_bytes = 2 * sum(int(a.size) * a.dtype.itemsize for a in packed)
    tb_cap = max(8, min(2048, int((vmem_limit - weight_bytes) // _PER_ROW_VMEM) // 8 * 8))

    tb = max(1, min(block_b, B, tb_cap))
    if B >= 16:
        # Keep >= 2 grid steps so ("parallel",) actually shards across both TCs on v7x.
        half = ((B + 1) // 2 + 7) // 8 * 8
        tb = min(tb, half)
    tb = max(8, (tb // 8) * 8)       # partial batch blocks: second-minor dim multiple of 8
    Bp = ((B + tb - 1) // tb) * tb

    # bf16 inputs: halves input HBM traffic + input double buffers; MXU sees identical bf16 bits.
    spec_in = spectral.astype(in_dtype)
    spat_in = space.reshape(B, Cs * H * W).astype(in_dtype)   # NCHW flat matches wc2 row order
    if Bp != B:
        spec_in = jnp.pad(spec_in, ((0, Bp - B), (0, 0)))
        spat_in = jnp.pad(spat_in, ((0, Bp - B), (0, 0)))
    # NOTE: padded rows produce garbage emb/out that are sliced away below; never consume them.

    def batch_spec(cols):
        return pl.BlockSpec((tb, cols), lambda i: (i, 0))

    def resident_spec(arr):
        # Constant block index -> fetched once, stays resident in VMEM across grid steps.
        # (If a bundle dump ever shows per-step re-DMA, add pipeline_mode=pl.Buffered(1).)
        return pl.BlockSpec(arr.shape, lambda i: (0, 0))

    emb, out = pl.pallas_call(
        f3fn_kernel,
        out_shape=(jax.ShapeDtypeStruct((Bp, emb_dim), jnp.float32),
                   jax.ShapeDtypeStruct((Bp, n_cls), jnp.float32)),
        grid=(Bp // tb,),
        in_specs=([batch_spec(L), batch_spec(Cs * H * W)]
                  + [resident_spec(a) for a in packed]),
        out_specs=(pl.BlockSpec((tb, emb_dim), lambda i: (i, 0)),
                   pl.BlockSpec((tb, n_cls), lambda i: (i, 0))),
        compiler_params=pltpu.CompilerParams(
            dimension_semantics=("parallel",),        # v7x: batch tiles sharded over both TCs
            vmem_limit_bytes=vmem_limit),
    )(spec_in, spat_in, *packed)
    return emb[:B], out[:B]


def make_f3fn(params, spectral_len, H, W, *, block_b=512, matmul_dtype=jnp.bfloat16):
    """Pack the weights ONCE and return a jitted forward(spectral, space) -> (embedding, out)."""
    packed = pack_params(params, spectral_len, H, W, matmul_dtype)
    fwd = jax.jit(functools.partial(f3fn_forward, block_b=block_b))
    return lambda spectral, space: fwd(spectral, space, packed)


# ----------------------------------------------------------------------------- init + reference

def init_params(key, spectral_channels, spatial_channels,
                c1=16, c2=16, branch=64, emb=128, n_cls=128):
    ks = jax.random.split(key, 16)

    def w(k, shape, fan_in):
        return (jax.random.normal(k, shape, jnp.float32) / jnp.sqrt(fan_in)).astype(jnp.float32)

    w1d = w(ks[0], (3, c1), 3.0)                                           # Conv1d(1->c1, k=3)
    b1d = w(ks[1], (1, c1), 10.0)
    w2d = w(ks[2], (3, 3, spatial_channels, c2), 9.0 * spatial_channels)   # Conv2d(Cs->c2, 3x3)
    b2d = w(ks[3], (1, c2), 10.0)
    w_sfc = w(ks[4], (c1, branch), float(c1));   b_sfc = w(ks[5], (1, branch), 10.0)
    w_pfc = w(ks[6], (c2, branch), float(c2));   b_pfc = w(ks[7], (1, branch), 10.0)
    w_fuse = w(ks[8], (2 * branch, emb), 2.0 * branch); b_fuse = w(ks[9], (1, emb), 10.0)
    w_d1 = w(ks[10], (emb, emb), float(emb));    b_d1 = w(ks[11], (1, emb), 10.0)
    w_d2 = w(ks[12], (emb, n_cls), float(emb));  b_d2 = w(ks[13], (1, n_cls), 10.0)
    return (w1d, b1d, w2d, b2d, w_sfc, b_sfc, w_pfc, b_pfc,
            w_fuse, b_fuse, w_d1, b_d1, w_d2, b_d2)


def f3fn_reference(spectral, space, p):
    """Pure-JAX f32 reference with the original module semantics (space is NCHW)."""
    (w1d, b1d, w2d, b2d, w_sfc, b_sfc, w_pfc, b_pfc,
     w_fuse, b_fuse, w_d1, b_d1, w_d2, b_d2) = p
    B, L = spectral.shape
    x = jnp.transpose(space, (0, 2, 3, 1))
    _, H, W, Cs = x.shape
    sp = jnp.pad(spectral, ((0, 0), (1, 1)))
    conv1 = sum(sp[:, k:k + L][:, :, None] * w1d[k][None, None, :] for k in range(3))
    conv1 = jnp.maximum(conv1 + b1d, 0.0)
    h_spec = jnp.maximum(conv1.mean(axis=1) @ w_sfc + b_sfc, 0.0)
    xp = jnp.pad(x, ((0, 0), (1, 1), (1, 1), (0, 0)))
    conv2 = sum(jnp.einsum('bhwc,cf->bhwf', xp[:, kh:kh + H, kw:kw + W, :], w2d[kh, kw])
                for kh in range(3) for kw in range(3))
    conv2 = jnp.maximum(conv2 + b2d, 0.0)
    h_spat = jnp.maximum(conv2.mean(axis=(1, 2)) @ w_pfc + b_pfc, 0.0)
    fused = jnp.concatenate([h_spec, h_spat], axis=-1)
    emb = fused @ w_fuse + b_fuse
    h = jnp.maximum(jnp.maximum(emb, 0.0) @ w_d1 + b_d1, 0.0)
    out = h @ w_d2 + b_d2
    return emb, out


if __name__ == "__main__":
    key = jax.random.PRNGKey(0)
    k_spec, k_spat, k_par = jax.random.split(key, 3)

    B = 16
    spectral_channels = 32   # spectral vector length
    spatial_channels = 4     # channels of the spatial patch
    H = Wd = 8               # spatial patch size

    # PyTorch-style inputs: spectral (B, L); space is NCHW (B, Cs, H, W)
    spectral = jax.random.normal(k_spec, (B, spectral_channels), jnp.float32)
    space = jax.random.normal(k_spat, (B, spatial_channels, H, Wd), jnp.float32)

    params = init_params(k_par, spectral_channels, spatial_channels)

    # Weights are packed ONCE here; the returned closure only runs the fused Pallas kernel.
    # With B=16 the tile heuristic gives TB=8 -> a 2-step batch grid (exercises the pipeline and
    # keeps both v7x TensorCores busy).
    forward = make_f3fn(params, spectral_channels, H, Wd)
    emb, out = forward(spectral, space)
    jax.block_until_ready((emb, out))

    emb_ref, out_ref = f3fn_reference(spectral, space, params)
    assert emb.shape == (B, 128) and out.shape == (B, 128)
    # Tolerance for bf16 MXU operands (accumulation is f32 via preferred_element_type).
    err_e = float(jnp.max(jnp.abs(emb - emb_ref)))
    err_o = float(jnp.max(jnp.abs(out - out_ref)))
    assert jnp.allclose(emb, emb_ref, atol=5e-2, rtol=5e-2), f"emb max err {err_e}"
    assert jnp.allclose(out, out_ref, atol=5e-2, rtol=5e-2), f"out max err {err_o}"
    print("KERNEL_OK")
</pallas_src>

<mosaic_0001>
module attributes {stable_mosaic.version = 11 : i64} {
  func.func @f3fn_kernel(%arg0: i32, %arg1: memref<8x32xbf16, #tpu.memory_space<vmem>>, %arg2: memref<8x256xbf16, #tpu.memory_space<vmem>>, %arg3: memref<32x512xbf16, #tpu.memory_space<vmem>>, %arg4: memref<1x512xf32, #tpu.memory_space<vmem>>, %arg5: memref<256x1024xbf16, #tpu.memory_space<vmem>>, %arg6: memref<1x1024xf32, #tpu.memory_space<vmem>>, %arg7: memref<512x128xbf16, #tpu.memory_space<vmem>>, %arg8: memref<1024x128xbf16, #tpu.memory_space<vmem>>, %arg9: memref<1x128xf32, #tpu.memory_space<vmem>>, %arg10: memref<128x128xbf16, #tpu.memory_space<vmem>>, %arg11: memref<1x128xf32, #tpu.memory_space<vmem>>, %arg12: memref<128x128xbf16, #tpu.memory_space<vmem>>, %arg13: memref<1x128xf32, #tpu.memory_space<vmem>>, %arg14: memref<128x128xbf16, #tpu.memory_space<vmem>>, %arg15: memref<1x128xf32, #tpu.memory_space<vmem>>, %arg16: memref<8x128xf32, #tpu.memory_space<vmem>>, %arg17: memref<8x128xf32, #tpu.memory_space<vmem>>) attributes {dimension_semantics = [#tpu.dimension_semantics<parallel>], iteration_bounds = array<i64: 2>, scalar_prefetch = 0 : i64, scratch_operands = 0 : i64, tpu.core_type = #tpu.core_type<tc>, window_params = [{transform_indices = @transform_0, window_bounds = array<i64: 8, 32>}, {transform_indices = @transform_1, window_bounds = array<i64: 8, 256>}, {pipeline_mode = #tpu.pipeline_mode<synchronous>, transform_indices = @transform_2, window_bounds = array<i64: 32, 512>}, {pipeline_mode = #tpu.pipeline_mode<synchronous>, transform_indices = @transform_3, window_bounds = array<i64: 1, 512>}, {pipeline_mode = #tpu.pipeline_mode<synchronous>, transform_indices = @transform_4, window_bounds = array<i64: 256, 1024>}, {pipeline_mode = #tpu.pipeline_mode<synchronous>, transform_indices = @transform_5, window_bounds = array<i64: 1, 1024>}, {pipeline_mode = #tpu.pipeline_mode<synchronous>, transform_indices = @transform_6, window_bounds = array<i64: 512, 128>}, {pipeline_mode = #tpu.pipeline_mode<synchronous>, transform_indices = @transform_7, window_bounds = array<i64: 1024, 128>}, {pipeline_mode = #tpu.pipeline_mode<synchronous>, transform_indices = @transform_8, window_bounds = array<i64: 1, 128>}, {pipeline_mode = #tpu.pipeline_mode<synchronous>, transform_indices = @transform_9, window_bounds = array<i64: 128, 128>}, {pipeline_mode = #tpu.pipeline_mode<synchronous>, transform_indices = @transform_10, window_bounds = array<i64: 1, 128>}, {pipeline_mode = #tpu.pipeline_mode<synchronous>, transform_indices = @transform_11, window_bounds = array<i64: 128, 128>}, {pipeline_mode = #tpu.pipeline_mode<synchronous>, transform_indices = @transform_12, window_bounds = array<i64: 1, 128>}, {pipeline_mode = #tpu.pipeline_mode<synchronous>, transform_indices = @transform_13, window_bounds = array<i64: 128, 128>}, {pipeline_mode = #tpu.pipeline_mode<synchronous>, transform_indices = @transform_14, window_bounds = array<i64: 1, 128>}, {transform_indices = @transform_15, window_bounds = array<i64: 8, 128>}, {transform_indices = @transform_16, window_bounds = array<i64: 8, 128>}]} {
    %c0 = arith.constant 0 : index
    %c0_0 = arith.constant 0 : index
    %0 = vector.load %arg1[%c0, %c0_0] : memref<8x32xbf16, #tpu.memory_space<vmem>>, vector<8x32xbf16>
    %c0_1 = arith.constant 0 : index
    %c0_2 = arith.constant 0 : index
    %1 = vector.load %arg3[%c0_1, %c0_2] : memref<32x512xbf16, #tpu.memory_space<vmem>>, vector<32x512xbf16>
    %cst = arith.constant dense<0.000000e+00> : vector<8x512xf32>
    %2 = tpu.matmul %0, %1, %cst {dimension_numbers = #tpu.dot_dimension_numbers<[1], [0], [0], [1], [0, 0, 1, 1], [], []>} : vector<8x32xbf16>, vector<32x512xbf16>, vector<8x512xf32> -> vector<8x512xf32>
    %c0_3 = arith.constant 0 : index
    %c0_4 = arith.constant 0 : index
    %3 = vector.load %arg4[%c0_3, %c0_4] : memref<1x512xf32, #tpu.memory_space<vmem>>, vector<1x512xf32>
    %4 = vector.broadcast %3 : vector<1x512xf32> to vector<8x512xf32>
    %5 = arith.addf %2, %4 : vector<8x512xf32>
    %cst_5 = arith.constant 0.000000e+00 : f32
    %6 = vector.broadcast %cst_5 : f32 to vector<8x512xf32>
    %7 = arith.maximumf %5, %6 : vector<8x512xf32>
    %8 = arith.truncf %7 : vector<8x512xf32> to vector<8x512xbf16>
    %c0_6 = arith.constant 0 : index
    %c0_7 = arith.constant 0 : index
    %9 = vector.load %arg2[%c0_6, %c0_7] : memref<8x256xbf16, #tpu.memory_space<vmem>>, vector<8x256xbf16>
    %c0_8 = arith.constant 0 : index
    %c0_9 = arith.constant 0 : index
    %10 = vector.load %arg5[%c0_8, %c0_9] : memref<256x1024xbf16, #tpu.memory_space<vmem>>, vector<256x1024xbf16>
    %cst_10 = arith.constant dense<0.000000e+00> : vector<8x1024xf32>
    %11 = tpu.matmul %9, %10, %cst_10 {dimension_numbers = #tpu.dot_dimension_numbers<[1], [0], [0], [1], [0, 0, 1, 1], [], []>} : vector<8x256xbf16>, vector<256x1024xbf16>, vector<8x1024xf32> -> vector<8x1024xf32>
    %c0_11 = arith.constant 0 : index
    %c0_12 = arith.constant 0 : index
    %12 = vector.load %arg6[%c0_11, %c0_12] : memref<1x1024xf32, #tpu.memory_space<vmem>>, vector<1x1024xf32>
    %13 = vector.broadcast %12 : vector<1x1024xf32> to vector<8x1024xf32>
    %14 = arith.addf %11, %13 : vector<8x1024xf32>
    %cst_13 = arith.constant 0.000000e+00 : f32
    %15 = vector.broadcast %cst_13 : f32 to vector<8x1024xf32>
    %16 = arith.maximumf %14, %15 : vector<8x1024xf32>
    %17 = arith.truncf %16 : vector<8x1024xf32> to vector<8x1024xbf16>
    %c0_14 = arith.constant 0 : index
    %c0_15 = arith.constant 0 : index
    %18 = vector.load %arg7[%c0_14, %c0_15] : memref<512x128xbf16, #tpu.memory_space<vmem>>, vector<512x128xbf16>
    %cst_16 = arith.constant dense<0.000000e+00> : vector<8x128xf32>
    %19 = tpu.matmul %8, %18, %cst_16 {dimension_numbers = #tpu.dot_dimension_numbers<[1], [0], [0], [1], [0, 0, 1, 1], [], []>} : vector<8x512xbf16>, vector<512x128xbf16>, vector<8x128xf32> -> vector<8x128xf32>
    %c0_17 = arith.constant 0 : index
    %c0_18 = arith.constant 0 : index
    %20 = vector.load %arg8[%c0_17, %c0_18] : memref<1024x128xbf16, #tpu.memory_space<vmem>>, vector<1024x128xbf16>
    %cst_19 = arith.constant dense<0.000000e+00> : vector<8x128xf32>
    %21 = tpu.matmul %17, %20, %cst_19 {dimension_numbers = #tpu.dot_dimension_numbers<[1], [0], [0], [1], [0, 0, 1, 1], [], []>} : vector<8x1024xbf16>, vector<1024x128xbf16>, vector<8x128xf32> -> vector<8x128xf32>
    %22 = arith.addf %19, %21 : vector<8x128xf32>
    %c0_20 = arith.constant 0 : index
    %c0_21 = arith.constant 0 : index
    %23 = vector.load %arg9[%c0_20, %c0_21] : memref<1x128xf32, #tpu.memory_space<vmem>>, vector<1x128xf32>
    %24 = vector.broadcast %23 : vector<1x128xf32> to vector<8x128xf32>
    %25 = arith.addf %22, %24 : vector<8x128xf32>
    %cst_22 = arith.constant 0.000000e+00 : f32
    %26 = vector.broadcast %cst_22 : f32 to vector<8x128xf32>
    %27 = arith.maximumf %25, %26 : vector<8x128xf32>
    %28 = arith.truncf %27 : vector<8x128xf32> to vector<8x128xbf16>
    %c0_23 = arith.constant 0 : index
    %c0_24 = arith.constant 0 : index
    %29 = vector.load %arg10[%c0_23, %c0_24] : memref<128x128xbf16, #tpu.memory_space<vmem>>, vector<128x128xbf16>
    %cst_25 = arith.constant dense<0.000000e+00> : vector<8x128xf32>
    %30 = tpu.matmul %28, %29, %cst_25 {dimension_numbers = #tpu.dot_dimension_numbers<[1], [0], [0], [1], [0, 0, 1, 1], [], []>} : vector<8x128xbf16>, vector<128x128xbf16>, vector<8x128xf32> -> vector<8x128xf32>
    %c0_26 = arith.constant 0 : index
    %c0_27 = arith.constant 0 : index
    %31 = vector.load %arg11[%c0_26, %c0_27] : memref<1x128xf32, #tpu.memory_space<vmem>>, vector<1x128xf32>
    %32 = vector.broadcast %31 : vector<1x128xf32> to vector<8x128xf32>
    %33 = arith.addf %30, %32 : vector<8x128xf32>
    %c0_28 = arith.constant 0 : index
    %c0_29 = arith.constant 0 : index
    %34 = vector.load %arg16[%c0_28, %c0_29] : memref<8x128xf32, #tpu.memory_space<vmem>>, vector<8x128xf32>
    tpu.vector_store %arg16[%c0_28, %c0_29], %33 {strides = array<i32>} : memref<8x128xf32, #tpu.memory_space<vmem>>, vector<8x128xf32>,
    %cst_30 = arith.constant 0.000000e+00 : f32
    %35 = vector.broadcast %cst_30 : f32 to vector<8x128xf32>
    %36 = arith.maximumf %33, %35 : vector<8x128xf32>
    %37 = arith.truncf %36 : vector<8x128xf32> to vector<8x128xbf16>
    %c0_31 = arith.constant 0 : index
    %c0_32 = arith.constant 0 : index
    %38 = vector.load %arg12[%c0_31, %c0_32] : memref<128x128xbf16, #tpu.memory_space<vmem>>, vector<128x128xbf16>
    %cst_33 = arith.constant dense<0.000000e+00> : vector<8x128xf32>
    %39 = tpu.matmul %37, %38, %cst_33 {dimension_numbers = #tpu.dot_dimension_numbers<[1], [0], [0], [1], [0, 0, 1, 1], [], []>} : vector<8x128xbf16>, vector<128x128xbf16>, vector<8x128xf32> -> vector<8x128xf32>
    %c0_34 = arith.constant 0 : index
    %c0_35 = arith.constant 0 : index
    %40 = vector.load %arg13[%c0_34, %c0_35] : memref<1x128xf32, #tpu.memory_space<vmem>>, vector<1x128xf32>
    %41 = vector.broadcast %40 : vector<1x128xf32> to vector<8x128xf32>
    %42 = arith.addf %39, %41 : vector<8x128xf32>
    %cst_36 = arith.constant 0.000000e+00 : f32
    %43 = vector.broadcast %cst_36 : f32 to vector<8x128xf32>
    %44 = arith.maximumf %42, %43 : vector<8x128xf32>
    %45 = arith.truncf %44 : vector<8x128xf32> to vector<8x128xbf16>
    %c0_37 = arith.constant 0 : index
    %c0_38 = arith.constant 0 : index
    %46 = vector.load %arg14[%c0_37, %c0_38] : memref<128x128xbf16, #tpu.memory_space<vmem>>, vector<128x128xbf16>
    %cst_39 = arith.constant dense<0.000000e+00> : vector<8x128xf32>
    %47 = tpu.matmul %45, %46, %cst_39 {dimension_numbers = #tpu.dot_dimension_numbers<[1], [0], [0], [1], [0, 0, 1, 1], [], []>} : vector<8x128xbf16>, vector<128x128xbf16>, vector<8x128xf32> -> vector<8x128xf32>
    %c0_40 = arith.constant 0 : index
    %c0_41 = arith.constant 0 : index
    %48 = vector.load %arg15[%c0_40, %c0_41] : memref<1x128xf32, #tpu.memory_space<vmem>>, vector<1x128xf32>
    %49 = vector.broadcast %48 : vector<1x128xf32> to vector<8x128xf32>
    %50 = arith.addf %47, %49 : vector<8x128xf32>
    %c0_42 = arith.constant 0 : index
    %c0_43 = arith.constant 0 : index
    %51 = vector.load %arg17[%c0_42, %c0_43] : memref<8x128xf32, #tpu.memory_space<vmem>>, vector<8x128xf32>
    tpu.vector_store %arg17[%c0_42, %c0_43], %50 {strides = array<i32>} : memref<8x128xf32, #tpu.memory_space<vmem>>, vector<8x128xf32>,
    return
  }
  func.func @transform_0(%arg0: i32) -> (i32, i32) {
    %c0_i32 = arith.constant 0 : i32
    %c0_i32_0 = arith.constant 0 : i32
    return %arg0, %c0_i32 : i32, i32
  }
  func.func @transform_1(%arg0: i32) -> (i32, i32) {
    %c0_i32 = arith.constant 0 : i32
    %c0_i32_0 = arith.constant 0 : i32
    return %arg0, %c0_i32 : i32, i32
  }
  func.func @transform_2(%arg0: i32) -> (i32, i32) {
    %c0_i32 = arith.constant 0 : i32
    %c0_i32_0 = arith.constant 0 : i32
    %c0_i32_1 = arith.constant 0 : i32
    return %c0_i32, %c0_i32_0 : i32, i32
  }
  func.func @transform_3(%arg0: i32) -> (i32, i32) {
    %c0_i32 = arith.constant 0 : i32
    %c0_i32_0 = arith.constant 0 : i32
    %c0_i32_1 = arith.constant 0 : i32
    return %c0_i32, %c0_i32_0 : i32, i32
  }
  func.func @transform_4(%arg0: i32) -> (i32, i32) {
    %c0_i32 = arith.constant 0 : i32
    %c0_i32_0 = arith.constant 0 : i32
    %c0_i32_1 = arith.constant 0 : i32
    return %c0_i32, %c0_i32_0 : i32, i32
  }
  func.func @transform_5(%arg0: i32) -> (i32, i32) {
    %c0_i32 = arith.constant 0 : i32
    %c0_i32_0 = arith.constant 0 : i32
    %c0_i32_1 = arith.constant 0 : i32
    return %c0_i32, %c0_i32_0 : i32, i32
  }
  func.func @transform_6(%arg0: i32) -> (i32, i32) {
    %c0_i32 = arith.constant 0 : i32
    %c0_i32_0 = arith.constant 0 : i32
    %c0_i32_1 = arith.constant 0 : i32
    return %c0_i32, %c0_i32_0 : i32, i32
  }
  func.func @transform_7(%arg0: i32) -> (i32, i32) {
    %c0_i32 = arith.constant 0 : i32
    %c0_i32_0 = arith.constant 0 : i32
    %c0_i32_1 = arith.constant 0 : i32
    return %c0_i32, %c0_i32_0 : i32, i32
  }
  func.func @transform_8(%arg0: i32) -> (i32, i32) {
    %c0_i32 = arith.constant 0 : i32
    %c0_i32_0 = arith.constant 0 : i32
    %c0_i32_1 = arith.constant 0 : i32
    return %c0_i32, %c0_i32_0 : i32, i32
  }
  func.func @transform_9(%arg0: i32) -> (i32, i32) {
    %c0_i32 = arith.constant 0 : i32
    %c0_i32_0 = arith.constant 0 : i32
    %c0_i32_1 = arith.constant 0 : i32
    return %c0_i32, %c0_i32_0 : i32, i32
  }
  func.func @transform_10(%arg0: i32) -> (i32, i32) {
    %c0_i32 = arith.constant 0 : i32
    %c0_i32_0 = arith.constant 0 : i32
    %c0_i32_1 = arith.constant 0 : i32
    return %c0_i32, %c0_i32_0 : i32, i32
  }
  func.func @transform_11(%arg0: i32) -> (i32, i32) {
    %c0_i32 = arith.constant 0 : i32
    %c0_i32_0 = arith.constant 0 : i32
    %c0_i32_1 = arith.constant 0 : i32
    return %c0_i32, %c0_i32_0 : i32, i32
  }
  func.func @transform_12(%arg0: i32) -> (i32, i32) {
    %c0_i32 = arith.constant 0 : i32
    %c0_i32_0 = arith.constant 0 : i32
    %c0_i32_1 = arith.constant 0 : i32
    return %c0_i32, %c0_i32_0 : i32, i32
  }
  func.func @transform_13(%arg0: i32) -> (i32, i32) {
    %c0_i32 = arith.constant 0 : i32
    %c0_i32_0 = arith.constant 0 : i32
    %c0_i32_1 = arith.constant 0 : i32
    return %c0_i32, %c0_i32_0 : i32, i32
  }
  func.func @transform_14(%arg0: i32) -> (i32, i32) {
    %c0_i32 = arith.constant 0 : i32
    %c0_i32_0 = arith.constant 0 : i32
    %c0_i32_1 = arith.constant 0 : i32
    return %c0_i32, %c0_i32_0 : i32, i32
  }
  func.func @transform_15(%arg0: i32) -> (i32, i32) {
    %c0_i32 = arith.constant 0 : i32
    %c0_i32_0 = arith.constant 0 : i32
    return %arg0, %c0_i32 : i32, i32
  }
  func.func @transform_16(%arg0: i32) -> (i32, i32) {
    %c0_i32 = arith.constant 0 : i32
    %c0_i32_0 = arith.constant 0 : i32
    return %arg0, %c0_i32 : i32, i32
  }
}

</mosaic_0001>

<bundles_post_ra>
// kernel: f3fn_forward.1
= control target key start
LH: loop header
LB: loop body
LE: loop exit
PB: predicated region body
PF: predicated region fallthrough
CT: control target
= control target key end

     0   :  { %s5428_s0 = inlined_call_operand.vmem [shape: bf16[16,32], index: 0, kind: input, shape index: {}]   ;;  %s5429_s1 = inlined_call_operand.vmem [shape: bf16[16,256], index: 1, kind: input, shape index: {}]   ;;  %s5430_s2 = inlined_call_operand.hbm [shape: bf16[32,512], index: 2, kind: input, shape index: {}]   ;;  %s5431_s3 = inlined_call_operand.vmem [shape: f32[1,512], index: 3, kind: input, shape index: {}]   ;;  %s5432_s4 = inlined_call_operand.hbm [shape: bf16[256,1024], index: 4, kind: input, shape index: {}]   ;;  %s5433_s5 = inlined_call_operand.vmem [shape: f32[1,1024], index: 5, kind: input, shape index: {}]   ;;  %s5434_s6 = inlined_call_operand.hbm [shape: bf16[512,128], index: 6, kind: input, shape index: {}]   ;;  %s5435_s7 = inlined_call_operand.vmem [shape: bf16[1024,128], index: 7, kind: input, shape index: {}]   ;;  %s5436_s8 = inlined_call_operand.vmem [shape: f32[1,128], index: 8, kind: input, shape index: {}]   ;;  %s5437_s9 = inlined_call_operand.hbm [shape: bf16[128,128], index: 9, kind: input, shape index: {}]   ;;  %s5438_s10 = inlined_call_operand.vmem [shape: f32[1,128], index: 10, kind: input, shape index: {}]   ;;  %s5439_s11 = inlined_call_operand.hbm [shape: bf16[128,128], index: 11, kind: input, shape index: {}]   ;;  %s5440_s12 = inlined_call_operand.vmem [shape: f32[1,128], index: 12, kind: input, shape index: {}]   ;;  %s5441_s13 = inlined_call_operand.hbm [shape: bf16[128,128], index: 13, kind: input, shape index: {}]   ;;  %s5442_s14 = inlined_call_operand.vmem [shape: f32[1,128], index: 14, kind: input, shape index: {}]   ;;  %s5443_s15 = inlined_call_operand.hbm [shape: f32[16,128], index: 15, kind: output, shape index: {0}]   ;;  %s5444_s16 = inlined_call_operand.hbm [shape: f32[16,128], index: 16, kind: output, shape index: {1}]  }
   0x1   :  { %5453 = sst [smem:[#allocation28_spill]] %s5428_s0 }
   0x2   :  { %5454 = sst [smem:[#allocation29_spill]] %s5430_s2 }
   0x3   :  { %5455 = sst [smem:[#allocation30_spill]] %s5432_s4 }
   0x4   :  { %5456 = sst [smem:[#allocation31_spill]] %s5434_s6 }
   0x5   :  { %5457 = sst [smem:[#allocation32_spill]] %s5437_s9 }
   0x6   :  { %5458 = sst [smem:[#allocation33_spill]] %s5442_s14 }
   0x7   :  { %5459 = sst [smem:[#allocation34_spill]] %s5443_s15 }
   0x8   :  { %5460 = sst [smem:[#allocation35_spill]] %s5444_s16 }
   0x9   :  { %22 = vsyncpa [#allocation3], 0 }
   0xa   :  { %23 = vsyncpa [#allocation6], 0 }
   0xb   :  { %24 = vsyncpa [#allocation9], 0 }
   0xc   :  { %25 = vsyncpa [#allocation12], 0 }
   0xd   :  { %26 = vsyncpa [#allocation4], 0 }
   0xe   :  { %28 = vsyncpa [#allocation4 + $0x1], 0 }
   0xf   :  { %29 = vsyncpa [#allocation15], 0 }
  0x10   :  { %31 = vsyncpa [#allocation15 + $0x1], 0  ;;  %s4985_s21 = smov 0   ;;  %s4987_s22 = smov 0  }
  0x11   :  { %s4989_s23 = smov 0   ;;  %s4991_s24 = smov 0  }
  0x12 LB: > { %5461 = sst [smem:[#allocation22_spill]] %s4874_s21  ;;  %s5006_s25 = sadd.s32 4294967295, %s4886_s24   ;;  %s4886_s24 = sphi %s4991_s24, %s5482_s24   ;;  %s4882_s23 = sphi %s4989_s23, %s5484_s23   ;;  %s4878_s22 = sphi %s4987_s22, %s5486_s22   ;;  %s4874_s21 = sphi %s4985_s21, %s5485_s21  }
  0x13   : > { %5462 = sst [smem:[#allocation23_spill]] %s4882_s23  ;;  %s3169_s26 = sadd.s32 4294967294, %s4886_s24  }
  0x14   : > { %5463 = sst [smem:[#allocation24_spill]] %s4886_s24  ;;  %s5010_s27 = sadd.s32 1, %s4886_s24  }
  0x15   : > { %5464 = sst [smem:[#allocation25_spill]] %s5010_s27  ;;  %s369_s28 = sadd.s32 1, %s4882_s23 }
  0x16   : > { %s366_s29 = ssub.s32 %s4886_s24, %s5010_s27  ;;  %p379_p0 = scmp.ne.s32.totalorder %s4882_s23, %s4878_s22 }
  0x17   : > { %p367_p1 = scmp.eq.s32.totalorder %s366_s29, 0  ;;  %p380_p2 = scmp.eq.s32.totalorder %s5006_s25, 1 }
  0x18   : > { %p385_p3 = scmp.ne.s32.totalorder %s4878_s22, %s4874_s21  ;;  %p386_p4 = scmp.eq.s32.totalorder %s3169_s26, 1 }
  0x19   : > { %s5021_s30 = scalar_select %p367_p1, %s4882_s23, %s369_s28  }
  0x1a   : > { %p5023_p5 = por %p380_p2, %p379_p0  ;;  %p5027_p6 = por %p386_p4, %p385_p3 }
  0x1b   : > { %5465 = sst [smem:[#allocation26_spill]] %s5021_s30  ;;  %p3170_p7 = scmp.ge.s32.totalorder %s4886_s24, 1 }
  0x1c   : > { %s5467_s17 = scalar_select %p5027_p6, 1, 0 }
  0x1d   : > { %p419_p8 = scmp.lt.s32.totalorder %s4886_s24, 3  ;;  %p4535_p9 = scmp.eq.s32.totalorder %s5006_s25, 0 }
  0x1e   : > { %5468 = sst [smem:[#allocation27_spill]] %s5467_s17  ;;  %s4888_s28 = smov [#allocation5]  }
  0x1f   : > { %p5034_p10 = pnand %p3170_p7, %p419_p8  ;;  %s5470_s4 = sld [smem:[#allocation30_spill]] }
  0x20   : > { %s449_s29 = sshll.u32 %s4888_s28, 4  ;;  %s5472_s9 = sld [smem:[#allocation32_spill]]  ;;  %s450_s29 = int_to_ptr.vmem [resolvable:$true] %s449_s29 }
  0x21   : > { %p4509_p11 = pneg %p5034_p10  ;;  %s4889_s19 = smov 512  }
  0x22   : > { %s4890_s20 = smov 32   ;;  %s5473_s2 = sld [smem:[#allocation29_spill]] }
  0x23   : > { %p5045_p12 = pnand %p4535_p9, %p4509_p11  ;;  %s4892_s16 = smov 64  }
  0x24   : > { %s4893_s23 = smov 4   ;;  %s4894_s27 = smov [#allocation2]  }
  0x25   : > { %s447_s26 = sshll.u32 %s5470_s4, 4  ;;  %s4891_s4 = smov [#allocation8]   ;;  %s448_s26 = int_to_ptr.hbm [resolvable:$true] %s447_s26 }
  0x26   : > { %s484_s17 = sshll.u32 %s5472_s9, 4  ;;  %s486_s28 = sshll.u32 %s4891_s4, 4  ;;  %s485_s17 = int_to_ptr.hbm [resolvable:$true] %s484_s17  ;;  %s487_s28 = int_to_ptr.vmem [resolvable:$true] %s486_s28 }
  0x27   : > { %4515 = dma.hbm_to_vmem [thread:$0]  (!%p5045_p12), %s448_s26, 16384, %s450_s29, [#allocation6], %s4889_s19, %s4889_s19, %s4890_s20  }
  0x28   : > { %s430_s14 = sshll.u32 %s5473_s2, 4  ;;  %s432_s9 = sshll.u32 %s4894_s27, 4  ;;  %s431_s14 = int_to_ptr.hbm [resolvable:$true] %s430_s14  ;;  %s433_s9 = int_to_ptr.vmem [resolvable:$true] %s432_s9 }
  0x29   : > { %4521 = dma.hbm_to_vmem [thread:$0]  (!%p5045_p12), %s485_s17, 1024, %s487_s28, [#allocation9], %s4892_s16, %s4892_s16, %s4893_s23  }
  0x2a   : > { %s5474_s6 = sld [smem:[#allocation31_spill]]  ;;  %s4895_s4 = smov 256  }
  0x2b   : > { %s4896_s19 = smov 16   ;;  %s4897_s21 = smov [#allocation7]  }
  0x2c   : > { %4512 = dma.hbm_to_vmem [thread:$0]  (!%p5045_p12), %s431_s14, 1024, %s433_s9, [#allocation3], %s4895_s4, %s4895_s4, %s4896_s19  }
  0x2d   : > { %s466_s24 = sshll.u32 %s4897_s21, 4  ;;  %s501_s17 = sshll.u32 %s5439_s11, 4  ;;  %s467_s24 = int_to_ptr.vmem [resolvable:$true] %s466_s24  ;;  %s502_s17 = int_to_ptr.hbm [resolvable:$true] %s501_s17 }
  0x2e   : > { %s518_s27 = sshll.u32 %s5441_s13, 4  ;;  %s4898_s26 = smov [#allocation10]   ;;  %s519_s27 = int_to_ptr.hbm [resolvable:$true] %s518_s27 }
  0x2f   : > { %s4899_s9 = smov [#allocation11]  }
  0x30   : > { %s464_s29 = sshll.u32 %s5474_s6, 4  ;;  %s503_s6 = sshll.u32 %s4898_s26, 4  ;;  %s465_s29 = int_to_ptr.hbm [resolvable:$true] %s464_s29  ;;  %s504_s6 = int_to_ptr.vmem [resolvable:$true] %s503_s6 }
  0x31   : > { %4518 = dma.hbm_to_vmem [thread:$0]  (!%p5045_p12), %s465_s29, 4096, %s467_s24, [#allocation6], %s4892_s16, %s4892_s16, %s4893_s23  }
  0x32   : > { %4524 = dma.hbm_to_vmem [thread:$0]  (!%p5045_p12), %s502_s17, 1024, %s504_s6, [#allocation9], %s4892_s16, %s4892_s16, %s4893_s23  }
  0x33   : > { %s520_s14 = sshll.u32 %s4899_s9, 4  ;;  %554 = sbr.rel (%p5034_p10) target bundleno = 908 (0x38c), region = 80  ;;  %s521_s14 = int_to_ptr.vmem [resolvable:$true] %s520_s14 }
  0x34   : > { %4527 = dma.hbm_to_vmem [thread:$0]  (!%p5045_p12), %s519_s27, 1024, %s521_s14, [#allocation12], %s4892_s16, %s4892_s16, %s4893_s23  }
  0x38   : > { %4849 = dma.done.wait (%p4535_p9), [#allocation3], 1024  }
  0x39   : > { %4851 = vsyncadd (%p4535_p9), [#allocation3], 4294966272 }
  0x3a   : > { %4853 = dma.done.wait (%p4535_p9), [#allocation6], 20480  }
  0x3b   : > { %4855 = vsyncadd (%p4535_p9), [#allocation6], 4294946816 }
  0x3c   : > { %4857 = dma.done.wait (%p4535_p9), [#allocation9], 2048  }
  0x3d   : > { %4859 = vsyncadd (%p4535_p9), [#allocation9], 4294965248 }
  0x3e   : > { %4861 = dma.done.wait (%p4535_p9), [#allocation12], 1024  }
  0x3f   : > { %4863 = vsyncadd (%p4535_p9), [#allocation12], 4294966272  ;;  %p639_p13 = scmp.lt.s32.totalorder %s5006_s25, 1  ;;  %v3208_v0 = vld [vmem:[#allocation2 + $0x20] sm:$0xf]  ;;  %s5475_s18 = sld [smem:[#allocation28_spill]] }
  0x40   : > { %v4231_v1 = vld [vmem:[#allocation2 + $0x2c] sm:$0xf0]  ;;  %v4229_v2 = vld [vmem:[#allocation2 + $0x24] sm:$0xf]  ;;  %v3210_v4 = vld [vmem:[#allocation2 + $0x30] sm:$0xf0] }
  0x41   : > { %s5096_s2 = scalar_select %p639_p13, %s5006_s25, 1  ;;  %v3209_v3 = vor.u32 %v4231_v1, %v3208_v0  ;;  %v3216_v5 = vld [vmem:[#allocation2 + $0x28] sm:$0xf]  ;;  %v4232_v6 = vld [vmem:[#allocation2 + $0x34] sm:$0xf0]  ;;  %v3213_v7 = vor.u32 %v4229_v2, %v3210_v4  ;;  %vm708_vm0 = vcmask 261120  }
  0x42   : > { %v3217_v8 = vor.u32 %v4232_v6, %v3216_v5  ;;  %v3452_v9 = vld [vmem:[#allocation5 + $0x1c0] sm:$0xf]  ;;  %v4227_v13 = vld [vmem:[#allocation2 + $0xc] sm:$0xf0]  ;;  %v4225_v14 = vld [vmem:[#allocation2 + $0x4] sm:$0xf] }
  0x43   : > { %s3187_s6 = sshll.u32 %s5096_s2, 2  ;;  %v4293_v10 = vld [vmem:[#allocation5 + $0x1dc] sm:$0xf0]  ;;  %718 = vmatpush.bf16.msra.mxu3 %v3209_v3  ;;  %v3194_v15 = vld [vmem:[#allocation2 + $0x10] sm:$0xf0]  ;;  %731 = vmatpush.bf16.msra.mxu1 %v3213_v7  ;;  %s4224_s29 = sshll.u32 %s5096_s2, 3 }
  0x44   : > { %v3192_v11 = vld [vmem:[#allocation2] sm:$0xf]  ;;  %v3453_v12 = vor.u32 %v4293_v10, %v3452_v9  ;;  %744 = vmatpush.bf16.msra.mxu2 %v3217_v8  ;;  %v3197_v17 = vor.u32 %v4225_v14, %v3194_v15  ;;  %v3200_v18 = vld [vmem:[#allocation2 + $0x8] sm:$0xf]  ;;  %v4228_v19 = vld [vmem:[#allocation2 + $0x14] sm:$0xf0]  ;;  %s647_s21 = scalar_lea.vmem %s5429_s1, %s4224_s29 }
  0x45   : > { %v3193_v16 = vor.u32 %v4227_v13, %v3192_v11  ;;  %v4230_v20 = vld [vmem:[#allocation2 + $0x2c] sm:$0xf]  ;;  %s642_s23 = scalar_lea.vmem %s5475_s18, %s3187_s6  ;;  %v3201_v21 = vor.u32 %v4228_v19, %v3200_v18  ;;  %v3218_v22 = vld [vmem:[#allocation2 + $0x38] sm:$0xf0]  ;;  %v3708_v23 = vld [vmem:[#allocation5 + $0x3c0] sm:$0xf] }
  0x46   : > { %1566 = vmatpush.bf16.msra.mxu0 %v3453_v12  ;;  %v4357_v24 = vld [vmem:[#allocation5 + $0x3dc] sm:$0xf0]  ;;  %v3221_v25 = vor.u32 %v4230_v20, %v3218_v22  ;;  %v4289_v27 = vld [vmem:[#allocation5 + $0x1c4] sm:$0xf]  ;;  %v4226_v34 = vld [vmem:[#allocation2 + $0xc] sm:$0xf] }
  0x47   : > { %v3709_v26 = vor.u32 %v4357_v24, %v3708_v23  ;;  %v3454_v28 = vld [vmem:[#allocation5 + $0x1e0] sm:$0xf0]  ;;  %719 = vmatpush.bf16.msra.mxu3 %v3193_v16  ;;  %v5102_v30 = vld [vmem:[%s642_s23] sm:$0xf]  ;;  %732 = vmatpush.bf16.msra.mxu1 %v3197_v17  ;;  %v3202_v35 = vld [vmem:[#allocation2 + $0x18] sm:$0xf0] }
  0x48   : > { %v3457_v29 = vor.u32 %v4289_v27, %v3454_v28  ;;  %v3420_v31 = vld [vmem:[#allocation5 + $0x180] sm:$0xf]  ;;  %745 = vmatpush.bf16.msra.mxu2 %v3201_v21  ;;  %v3205_v37 = vor.u32 %v4226_v34, %v3202_v35  ;;  %v4281_v39 = vld [vmem:[#allocation5 + $0x184] sm:$0xf]  ;;  %s5366_s20 = sand.u32 1, %s4878_s22   ;;  %s4220_s14 = sshll.u32 %s5006_s25, 3 }
  0x49   : > { %v4285_v32 = vld [vmem:[#allocation5 + $0x19c] sm:$0xf0]  ;;  %v3422_v40 = vld [vmem:[#allocation5 + $0x1a0] sm:$0xf0]  ;;  %s3185_s17 = sshll.u32 %s5366_s20, 3  ;;  %s5476_s16 = sld [smem:[#allocation34_spill]] }
  0x4a   : > { %v3421_v33 = vor.u32 %v4285_v32, %v3420_v31  ;;  %v3676_v36 = vld [vmem:[#allocation5 + $0x380] sm:$0xf]  ;;  %3222 = vmatmul.msk.bf16.vlgmr.msra.gmra.mxu3 %vm708_vm0, %v5102_v30  ;;  %v4353_v42 = vld [vmem:[#allocation5 + $0x3c4] sm:$0xf]  ;;  %v3425_v45 = vor.u32 %v4281_v39, %v3422_v40  ;;  %3223 = vmatmul.msk.bf16.vlgmr.msra.gmra.mxu1 %vm708_vm0, %v5102_v30  ;;  %s631_s27 = scalar_lea.vmem [#allocation13], %s3185_s17  ;;  %s2971_s29 = scalar_lea.sflag [#allocation4], %s5366_s20 }
  0x4b   : > { %757 = vmatpush.bf16.msrb.mxu3 %v3221_v25  ;;  %1579 = vmatpush.bf16.msrb.mxu1 %v3709_v26  ;;  %v4349_v38 = vld [vmem:[#allocation5 + $0x39c] sm:$0xf0]  ;;  %v3710_v43 = vld [vmem:[#allocation5 + $0x3e0] sm:$0xf0]  ;;  %s2988_s18 = sshll.u32 %s631_s27, 4  ;;  %s2989_s18 = int_to_ptr.vmem [resolvable:$true] %s2988_s18 }
  0x4c   : > { %1592 = vmatpush.bf16.msrb.mxu2 %v3457_v29  ;;  %v3677_v41 = vor.u32 %v4349_v38, %v3676_v36  ;;  %v3388_v44 = vld [vmem:[#allocation5 + $0x140] sm:$0xf]  ;;  %1567 = vmatpush.bf16.msra.mxu0 %v3421_v33  ;;  %v3713_v46 = vor.u32 %v4353_v42, %v3710_v43  ;;  %v4273_v51 = vld [vmem:[#allocation5 + $0x144] sm:$0xf] }
  0x4d   : > { %v4277_v47 = vld [vmem:[#allocation5 + $0x15c] sm:$0xf0]  ;;  %3224 = vmatmul.msk.bf16.vlgmr.msra.gmra.mxu2 %vm708_vm0, %v5102_v30  ;;  %v3390_v52 = vld [vmem:[#allocation5 + $0x160] sm:$0xf0] }
  0x4e   : > { %v3644_v48 = vld [vmem:[#allocation5 + $0x340] sm:$0xf]  ;;  %v3389_v50 = vor.u32 %v4277_v47, %v3388_v44  ;;  %v4345_v53 = vld [vmem:[#allocation5 + $0x384] sm:$0xf]  ;;  %v3393_v58 = vor.u32 %v4273_v51, %v3390_v52  ;;  %v3460_v44 = vld [vmem:[#allocation5 + $0x1c8] sm:$0xf] }
  0x4f   : > { %v4341_v49 = vld [vmem:[#allocation5 + $0x35c] sm:$0xf0]  ;;  %758 = vmatpush.bf16.msrb.mxu3 %v3205_v37  ;;  %1580 = vmatpush.bf16.msrb.mxu1 %v3677_v41  ;;  %v3678_v55 = vld [vmem:[#allocation5 + $0x3a0] sm:$0xf0]  ;;  %s2986_s30 = scalar_lea.hbm %s5476_s16, %s4220_s14  ;;  %s4796_s25 = scalar_lea.hbm %s5476_s16, 16 }
  0x50   : > { %v3645_v54 = vor.u32 %v4341_v49, %v3644_v48  ;;  %v3356_v56 = vld [vmem:[#allocation5 + $0x100] sm:$0xf]  ;;  %1593 = vmatpush.bf16.msrb.mxu2 %v3425_v45  ;;  %v3681_v59 = vor.u32 %v4345_v53, %v3678_v55  ;;  %v4265_v62 = vld [vmem:[#allocation5 + $0x104] sm:$0xf]  ;;  %1568 = vmatpush.bf16.msra.mxu0 %v3389_v50  ;;  %v4294_v45 = vld [vmem:[#allocation5 + $0x1e4] sm:$0xf0] }
  0x51   : > { %v4269_v57 = vld [vmem:[#allocation5 + $0x11c] sm:$0xf0]  ;;  %v3358_v0 = vld [vmem:[#allocation5 + $0x120] sm:$0xf0]  ;;  %s2990_s23 = sshll.u32 %s2986_s30, 4  ;;  %s2991_s23 = int_to_ptr.hbm [resolvable:$true] %s2990_s23 }
  0x52   : > { %v3612_v60 = vld [vmem:[#allocation5 + $0x300] sm:$0xf]  ;;  %v3357_v63 = vor.u32 %v4269_v57, %v3356_v56  ;;  %v4337_v1 = vld [vmem:[#allocation5 + $0x344] sm:$0xf]  ;;  %v3361_v6 = vor.u32 %v4265_v62, %v3358_v0  ;;  %v3461_v56 = vor.u32 %v4294_v45, %v3460_v44  ;;  %v4358_v57 = vld [vmem:[#allocation5 + $0x3e4] sm:$0xf0] }
  0x53   : > { %1605 = vmatpush.bf16.msra.mxu3 %v3713_v46  ;;  %v4333_v61 = vld [vmem:[#allocation5 + $0x31c] sm:$0xf0]  ;;  %v3646_v2 = vld [vmem:[#allocation5 + $0x360] sm:$0xf0]  ;;  %1581 = vmatpush.bf16.msrb.mxu1 %v3645_v54  ;;  %v3428_v62 = vld [vmem:[#allocation5 + $0x188] sm:$0xf] }
  0x54   : > { %v3324_v3 = vld [vmem:[#allocation5 + $0xc0] sm:$0xf]  ;;  %v3613_v5 = vor.u32 %v4333_v61, %v3612_v60  ;;  %1594 = vmatpush.bf16.msrb.mxu2 %v3393_v58  ;;  %v3649_v7 = vor.u32 %v4337_v1, %v3646_v2  ;;  %v4257_v10 = vld [vmem:[#allocation5 + $0xc4] sm:$0xf]  ;;  %1569 = vmatpush.bf16.msra.mxu0 %v3357_v63  ;;  %v4290_v58 = vld [vmem:[#allocation5 + $0x1cc] sm:$0xf] }
  0x55   : > { %v4261_v4 = vld [vmem:[#allocation5 + $0xdc] sm:$0xf0]  ;;  %v3326_v12 = vld [vmem:[#allocation5 + $0xe0] sm:$0xf0]  ;;  %v4286_v63 = vld [vmem:[#allocation5 + $0x1a4] sm:$0xf0] }
  0x56   : > { %v3580_v8 = vld [vmem:[#allocation5 + $0x2c0] sm:$0xf]  ;;  %v3325_v11 = vor.u32 %v4261_v4, %v3324_v3  ;;  %v4329_v13 = vld [vmem:[#allocation5 + $0x304] sm:$0xf]  ;;  %v3329_v18 = vor.u32 %v4257_v10, %v3326_v12  ;;  %v4282_v10 = vld [vmem:[#allocation5 + $0x18c] sm:$0xf] }
  0x57   : > { %1606 = vmatpush.bf16.msra.mxu3 %v3681_v59  ;;  %v4325_v9 = vld [vmem:[#allocation5 + $0x2dc] sm:$0xf0]  ;;  %v3614_v14 = vld [vmem:[#allocation5 + $0x320] sm:$0xf0]  ;;  %1582 = vmatpush.bf16.msrb.mxu1 %v3613_v5  ;;  %v3462_v59 = vld [vmem:[#allocation5 + $0x1e8] sm:$0xf0] }
  0x58   : > { %v3292_v15 = vld [vmem:[#allocation5 + $0x80] sm:$0xf]  ;;  %v3581_v17 = vor.u32 %v4325_v9, %v3580_v8  ;;  %1595 = vmatpush.bf16.msrb.mxu2 %v3361_v6  ;;  %v3617_v19 = vor.u32 %v4329_v13, %v3614_v14  ;;  %v4249_v22 = vld [vmem:[#allocation5 + $0x84] sm:$0xf]  ;;  %1570 = vmatpush.bf16.msra.mxu0 %v3325_v11  ;;  %v3465_v4 = vor.u32 %v4290_v58, %v3462_v59  ;;  %v3684_v6 = vld [vmem:[#allocation5 + $0x388] sm:$0xf] }
  0x59   : > { %v4253_v16 = vld [vmem:[#allocation5 + $0x9c] sm:$0xf0]  ;;  %v3294_v24 = vld [vmem:[#allocation5 + $0xa0] sm:$0xf0]  ;;  %v3429_v9 = vor.u32 %v4286_v63, %v3428_v62  ;;  %v3430_v11 = vld [vmem:[#allocation5 + $0x1a8] sm:$0xf0] }
  0x5a   : > { %v3548_v20 = vld [vmem:[#allocation5 + $0x280] sm:$0xf]  ;;  %v3293_v23 = vor.u32 %v4253_v16, %v3292_v15  ;;  %v4321_v25 = vld [vmem:[#allocation5 + $0x2c4] sm:$0xf]  ;;  %v3297_v31 = vor.u32 %v4249_v22, %v3294_v24  ;;  %3225 = vmatmul.msk.bf16.vlgmr.msrb.gmra.mxu3 %vm708_vm0, %v5102_v30  ;;  %v3716_v30 = vld [vmem:[#allocation5 + $0x3c8] sm:$0xf] }
  0x5b   : > { %1607 = vmatpush.bf16.msra.mxu3 %v3649_v7  ;;  %v4317_v21 = vld [vmem:[#allocation5 + $0x29c] sm:$0xf0]  ;;  %v3582_v26 = vld [vmem:[#allocation5 + $0x2e0] sm:$0xf0]  ;;  %1583 = vmatpush.bf16.msrb.mxu1 %v3581_v17  ;;  %v3717_v3 = vor.u32 %v4358_v57, %v3716_v30  ;;  %v4350_v7 = vld [vmem:[#allocation5 + $0x3a4] sm:$0xf0] }
  0x5c   : > { %v3260_v27 = vld [vmem:[#allocation5 + $0x40] sm:$0xf]  ;;  %v3549_v29 = vor.u32 %v4317_v21, %v3548_v20  ;;  %1596 = vmatpush.bf16.msrb.mxu2 %v3329_v18  ;;  %v3585_v32 = vor.u32 %v4321_v25, %v3582_v26  ;;  %v4241_v35 = vld [vmem:[#allocation5 + $0x44] sm:$0xf]  ;;  %1571 = vmatpush.bf16.msra.mxu0 %v3293_v23  ;;  %v4354_v12 = vld [vmem:[#allocation5 + $0x3cc] sm:$0xf]  ;;  %v3685_v18 = vor.u32 %v4350_v7, %v3684_v6 }
  0x5d   : > { %v4245_v28 = vld [vmem:[#allocation5 + $0x5c] sm:$0xf0]  ;;  %v3262_v37 = vld [vmem:[#allocation5 + $0x60] sm:$0xf0]  ;;  %v3718_v14 = vld [vmem:[#allocation5 + $0x3e8] sm:$0xf0] }
  0x5e   : > { %v3516_v33 = vld [vmem:[#allocation5 + $0x240] sm:$0xf]  ;;  %v3261_v36 = vor.u32 %v4245_v28, %v3260_v27  ;;  %v4313_v38 = vld [vmem:[#allocation5 + $0x284] sm:$0xf]  ;;  %v3265_v47 = vor.u32 %v4241_v35, %v3262_v37  ;;  %v3396_v15 = vld [vmem:[#allocation5 + $0x148] sm:$0xf]  ;;  %v3721_v22 = vor.u32 %v4354_v12, %v3718_v14 }
  0x5f   : > { %1608 = vmatpush.bf16.msra.mxu3 %v3617_v19  ;;  %v4309_v34 = vld [vmem:[#allocation5 + $0x25c] sm:$0xf0]  ;;  %v3550_v39 = vld [vmem:[#allocation5 + $0x2a0] sm:$0xf0]  ;;  %1584 = vmatpush.bf16.msrb.mxu1 %v3549_v29  ;;  %v4278_v16 = vld [vmem:[#allocation5 + $0x164] sm:$0xf0]  ;;  %v3433_v19 = vor.u32 %v4282_v10, %v3430_v11 }
  0x60   : > { %v772_v40 = vld [vmem:[%s647_s21] sm:$0xff]  ;;  %v3517_v43 = vor.u32 %v4309_v34, %v3516_v33  ;;  %1597 = vmatpush.bf16.msrb.mxu2 %v3297_v31  ;;  %v3553_v48 = vor.u32 %v4313_v38, %v3550_v39  ;;  %1572 = vmatpush.bf16.msra.mxu0 %v3261_v36  ;;  %v3652_v20 = vld [vmem:[#allocation5 + $0x348] sm:$0xf]  ;;  %v3397_v23 = vor.u32 %v4278_v16, %v3396_v15  ;;  %v4274_v24 = vld [vmem:[#allocation5 + $0x14c] sm:$0xf]  ;;  %s4790_s4 = sshra.s32 %s2991_s23, 4  ;;  %s4791_s4 = int_to_ptr.hbm [resolvable:$true] %s4790_s4 }
  0x61   : > { %v3228_v41 = vld [vmem:[#allocation5] sm:$0xf]  ;;  %v4233_v50 = vld [vmem:[#allocation5 + $0x4] sm:$0xf]  ;;  %v921_v55 = vunpack.c.h.b16 %v772_v40  ;;  %v920_v60 = vunpack.c.l.b16 %v772_v40  ;;  %v4342_v21 = vld [vmem:[#allocation5 + $0x364] sm:$0xf0]  ;;  %p4797_p3 = scmp.lt.s32.totalorder %s4791_s4, %s5476_s16 }
  0x62   : > { %v4237_v42 = vld [vmem:[#allocation5 + $0x1c] sm:$0xf0]  ;;  %v3230_v51 = vld [vmem:[#allocation5 + $0x20] sm:$0xf0]  ;;  %v3398_v25 = vld [vmem:[#allocation5 + $0x168] sm:$0xf0]  ;;  %v3653_v31 = vor.u32 %v4342_v21, %v3652_v20 }
  0x63   : > { %v3484_v46 = vld [vmem:[#allocation5 + $0x200] sm:$0xf]  ;;  %1609 = vmatpush.bf16.msra.mxu3 %v3585_v32  ;;  %v3229_v52 = vor.u32 %v4237_v42, %v3228_v41  ;;  %v4305_v53 = vld [vmem:[#allocation5 + $0x244] sm:$0xf]  ;;  %1585 = vmatpush.bf16.msrb.mxu1 %v3517_v43  ;;  %v3233_v0 = vor.u32 %v4233_v50, %v3230_v51  ;;  %v5116_v8 = vpack.c.b16 %v921_v55, %v921_v55  ;;  %v4346_v26 = vld [vmem:[#allocation5 + $0x38c] sm:$0xf] }
  0x64   : > { %v4301_v49 = vld [vmem:[#allocation5 + $0x21c] sm:$0xf0]  ;;  %v3518_v54 = vld [vmem:[#allocation5 + $0x260] sm:$0xf0]  ;;  %1598 = vmatpush.bf16.msrb.mxu2 %v3265_v47  ;;  %v5118_v13 = vpack.c.b16 %v920_v60, %v920_v60  ;;  %v3686_v27 = vld [vmem:[#allocation5 + $0x3a8] sm:$0xf0]  ;;  %v3401_v32 = vor.u32 %v4274_v24, %v3398_v25 }
  0x65   : > { %v3485_v61 = vor.u32 %v4301_v49, %v3484_v46  ;;  %v3521_v1 = vor.u32 %v4305_v53, %v3518_v54  ;;  %v4297_v2 = vld [vmem:[#allocation5 + $0x204] sm:$0xf]  ;;  %1573 = vmatpush.bf16.msra.mxu0 %v3229_v52  ;;  %v3364_v28 = vld [vmem:[#allocation5 + $0x108] sm:$0xf]  ;;  %v3689_v35 = vor.u32 %v4346_v26, %v3686_v27  ;;  %v4266_v37 = vld [vmem:[#allocation5 + $0x10c] sm:$0xf] }
  0x66   : > { %v3486_v5 = vld [vmem:[#allocation5 + $0x220] sm:$0xf0]  ;;  %v4270_v29 = vld [vmem:[#allocation5 + $0x124] sm:$0xf0]  ;;  %v3366_v38 = vld [vmem:[#allocation5 + $0x128] sm:$0xf0] }
  0x67   : > { %1610 = vmatpush.bf16.msra.mxu3 %v3553_v48  ;;  %1586 = vmatpush.bf16.msrb.mxu1 %v3485_v61  ;;  %v3489_v17 = vor.u32 %v4297_v2, %v3486_v5  ;;  %v3620_v33 = vld [vmem:[#allocation5 + $0x308] sm:$0xf]  ;;  %v3365_v36 = vor.u32 %v4270_v29, %v3364_v28  ;;  %v4338_v39 = vld [vmem:[#allocation5 + $0x34c] sm:$0xf]  ;;  %v3369_v44 = vor.u32 %v4266_v37, %v3366_v38  ;;  %v3468_v16 = vld [vmem:[#allocation5 + $0x1d0] sm:$0xf] }
  0x68   : > { %1599 = vmatpush.bf16.msrb.mxu2 %v3233_v0  ;;  %1574 = vmatmul.bf16.vlgmr.msra.gmra.mxu0 %v5118_v13  ;;  %v4334_v34 = vld [vmem:[#allocation5 + $0x324] sm:$0xf0]  ;;  %v3654_v40 = vld [vmem:[#allocation5 + $0x368] sm:$0xf0]  ;;  %v3724_v29 = vld [vmem:[#allocation5 + $0x3d0] sm:$0xf] }
  0x69   : > { %1618 = vmatpush.bf16.msrb.mxu0 %v3461_v56  ;;  %v3332_v41 = vld [vmem:[#allocation5 + $0xc8] sm:$0xf]  ;;  %v3621_v43 = vor.u32 %v4334_v34, %v3620_v33  ;;  %v3657_v47 = vor.u32 %v4338_v39, %v3654_v40  ;;  %v4258_v49 = vld [vmem:[#allocation5 + $0xcc] sm:$0xf]  ;;  %v3470_v33 = vld [vmem:[#allocation5 + $0x1f0] sm:$0xf0] }
  0x6a   : > { %1587 = vmatmul.bf16.vlgmr.msrb.gmra.mxu1 %v5116_v8  ;;  %v4262_v42 = vld [vmem:[#allocation5 + $0xe4] sm:$0xf0]  ;;  %v3334_v50 = vld [vmem:[#allocation5 + $0xe8] sm:$0xf0]  ;;  %v3436_v34 = vld [vmem:[#allocation5 + $0x190] sm:$0xf] }
  0x6b   : > { %1611 = vmatpush.bf16.msra.mxu3 %v3521_v1  ;;  %1631 = vmatpush.bf16.msra.mxu1 %v3717_v3  ;;  %v3588_v45 = vld [vmem:[#allocation5 + $0x2c8] sm:$0xf]  ;;  %v3333_v48 = vor.u32 %v4262_v42, %v3332_v41  ;;  %v4330_v51 = vld [vmem:[#allocation5 + $0x30c] sm:$0xf]  ;;  %v3337_v55 = vor.u32 %v4258_v49, %v3334_v50  ;;  %v3726_v49 = vld [vmem:[#allocation5 + $0x3f0] sm:$0xf0] }
  0x6c   : > { %1644 = vmatpush.bf16.msra.mxu2 %v3465_v4  ;;  %v4326_v46 = vld [vmem:[#allocation5 + $0x2e4] sm:$0xf0]  ;;  %v3622_v52 = vld [vmem:[#allocation5 + $0x328] sm:$0xf0]  ;;  %v3404_v50 = vld [vmem:[#allocation5 + $0x150] sm:$0xf] }
  0x6d   : > { %1619 = vmatpush.bf16.msrb.mxu0 %v3429_v9  ;;  %1600 = vmatmul.bf16.vlgmr.msrb.gmra.mxu2 %v5118_v13  ;;  %v3300_v53 = vld [vmem:[#allocation5 + $0x88] sm:$0xf]  ;;  %v3589_v30 = vor.u32 %v4326_v46, %v3588_v45  ;;  %v3625_v58 = vor.u32 %v4330_v51, %v3622_v52  ;;  %v4250_v60 = vld [vmem:[#allocation5 + $0x8c] sm:$0xf]  ;;  %v4351_v45 = vld [vmem:[#allocation5 + $0x3ac] sm:$0xf0] }
  0x6e   : > { %v4254_v54 = vld [vmem:[#allocation5 + $0xa4] sm:$0xf0]  ;;  %v3302_v61 = vld [vmem:[#allocation5 + $0xa8] sm:$0xf0]  ;;  %v4283_v46 = vld [vmem:[#allocation5 + $0x194] sm:$0xf] }
  0x6f   : > { %1612 = vmatpush.bf16.msra.mxu3 %v3489_v17  ;;  %1632 = vmatpush.bf16.msra.mxu1 %v3685_v18  ;;  %v3556_v56 = vld [vmem:[#allocation5 + $0x288] sm:$0xf]  ;;  %v3301_v59 = vor.u32 %v4254_v54, %v3300_v53  ;;  %v4322_v62 = vld [vmem:[#allocation5 + $0x2cc] sm:$0xf]  ;;  %v3305_v3 = vor.u32 %v4250_v60, %v3302_v61  ;;  %v4295_v17 = vld [vmem:[#allocation5 + $0x1ec] sm:$0xf0] }
  0x70   : > { %1645 = vmatpush.bf16.msra.mxu2 %v3433_v19  ;;  %v4318_v57 = vld [vmem:[#allocation5 + $0x2a4] sm:$0xf0]  ;;  %v3590_v63 = vld [vmem:[#allocation5 + $0x2e8] sm:$0xf0]  ;;  %v3469_v28 = vor.u32 %v4295_v17, %v3468_v16  ;;  %v4279_v51 = vld [vmem:[#allocation5 + $0x16c] sm:$0xf0] }
  0x71   : > { %1620 = vmatpush.bf16.msrb.mxu0 %v3397_v23  ;;  %v3268_v0 = vld [vmem:[#allocation5 + $0x48] sm:$0xf]  ;;  %v3557_v2 = vor.u32 %v4318_v57, %v3556_v56  ;;  %v3593_v6 = vor.u32 %v4322_v62, %v3590_v63  ;;  %v4242_v9 = vld [vmem:[#allocation5 + $0x4c] sm:$0xf]  ;;  %v4343_v56 = vld [vmem:[#allocation5 + $0x36c] sm:$0xf0] }
  0x72   : > { %1613 = vmatmul.bf16.vlgmr.msra.gmra.mxu3 %v5116_v8  ;;  %v4246_v1 = vld [vmem:[#allocation5 + $0x64] sm:$0xf0]  ;;  %v3270_v10 = vld [vmem:[#allocation5 + $0x68] sm:$0xf0]  ;;  %v4275_v57 = vld [vmem:[#allocation5 + $0x154] sm:$0xf] }
  0x73   : > { %1657 = vmatpush.bf16.msrb.mxu3 %v3721_v22  ;;  %1633 = vmatpush.bf16.msra.mxu1 %v3653_v31  ;;  %v3524_v4 = vld [vmem:[#allocation5 + $0x248] sm:$0xf]  ;;  %v3269_v7 = vor.u32 %v4246_v1, %v3268_v0  ;;  %v4314_v11 = vld [vmem:[#allocation5 + $0x28c] sm:$0xf]  ;;  %v3273_v19 = vor.u32 %v4242_v9, %v3270_v10  ;;  %v4359_v31 = vld [vmem:[#allocation5 + $0x3ec] sm:$0xf0] }
  0x74   : > { %1646 = vmatpush.bf16.msra.mxu2 %v3401_v32  ;;  %v4310_v5 = vld [vmem:[#allocation5 + $0x264] sm:$0xf0]  ;;  %v3558_v12 = vld [vmem:[#allocation5 + $0x2a8] sm:$0xf0]  ;;  %v4291_v32 = vld [vmem:[#allocation5 + $0x1d4] sm:$0xf]  ;;  %v3725_v39 = vor.u32 %v4359_v31, %v3724_v29 }
  0x75   : > { %1621 = vmatpush.bf16.msrb.mxu0 %v3365_v36  ;;  %v3236_v14 = vld [vmem:[#allocation5 + $0x8] sm:$0xf]  ;;  %v3525_v18 = vor.u32 %v4310_v5, %v3524_v4  ;;  %v4234_v22 = vld [vmem:[#allocation5 + $0xc] sm:$0xf]  ;;  %v3561_v23 = vor.u32 %v4314_v11, %v3558_v12  ;;  %v3473_v42 = vor.u32 %v4291_v32, %v3470_v33  ;;  %v4347_v60 = vld [vmem:[#allocation5 + $0x394] sm:$0xf] }
  0x76   : > { %v4238_v15 = vld [vmem:[#allocation5 + $0x24] sm:$0xf0]  ;;  %v3238_v25 = vld [vmem:[#allocation5 + $0x28] sm:$0xf0]  ;;  %v3694_v61 = vld [vmem:[#allocation5 + $0x3b0] sm:$0xf0] }
  0x77   : > { %1658 = vmatpush.bf16.msrb.mxu3 %v3689_v35  ;;  %1634 = vmatpush.bf16.msra.mxu1 %v3621_v43  ;;  %v3492_v20 = vld [vmem:[#allocation5 + $0x208] sm:$0xf]  ;;  %v3237_v24 = vor.u32 %v4238_v15, %v3236_v14  ;;  %v4306_v26 = vld [vmem:[#allocation5 + $0x24c] sm:$0xf]  ;;  %v4287_v35 = vld [vmem:[#allocation5 + $0x1ac] sm:$0xf0]  ;;  %v3241_v37 = vor.u32 %v4234_v22, %v3238_v25 }
  0x78   : > { %1647 = vmatpush.bf16.msra.mxu2 %v3369_v44  ;;  %v4302_v21 = vld [vmem:[#allocation5 + $0x224] sm:$0xf0]  ;;  %v3526_v27 = vld [vmem:[#allocation5 + $0x268] sm:$0xf0]  ;;  %v3437_v43 = vor.u32 %v4287_v35, %v3436_v34  ;;  %v3692_v44 = vld [vmem:[#allocation5 + $0x390] sm:$0xf] }
  0x79   : > { %1622 = vmatpush.bf16.msrb.mxu0 %v3333_v48  ;;  %v3493_v36 = vor.u32 %v4302_v21, %v3492_v20  ;;  %v3529_v38 = vor.u32 %v4306_v26, %v3526_v27  ;;  %v4298_v40 = vld [vmem:[#allocation5 + $0x20c] sm:$0xf]  ;;  %v4355_v48 = vld [vmem:[#allocation5 + $0x3d4] sm:$0xf]  ;;  %v3693_v53 = vor.u32 %v4351_v45, %v3692_v44  ;;  %v3372_v62 = vld [vmem:[#allocation5 + $0x110] sm:$0xf] }
  0x7a   : > { %v3494_v41 = vld [vmem:[#allocation5 + $0x228] sm:$0xf0]  ;;  %v4271_v63 = vld [vmem:[#allocation5 + $0x12c] sm:$0xf0]  ;;  %v4267_v5 = vld [vmem:[#allocation5 + $0x114] sm:$0xf] }
  0x7b   : > { %1659 = vmatpush.bf16.msrb.mxu3 %v3657_v47  ;;  %1635 = vmatpush.bf16.msra.mxu1 %v3589_v30  ;;  %v3438_v47 = vld [vmem:[#allocation5 + $0x1b0] sm:$0xf0]  ;;  %v3497_v52 = vor.u32 %v4298_v40, %v3494_v41  ;;  %v3729_v30 = vor.u32 %v4355_v48, %v3726_v49  ;;  %v4335_v4 = vld [vmem:[#allocation5 + $0x32c] sm:$0xf0]  ;;  %s4792_s19 = scalar_lea.hbm %s4791_s4, 8 }
  0x7c   : > { %1648 = vmatpush.bf16.msra.mxu2 %v3337_v55  ;;  %v3441_v54 = vor.u32 %v4283_v46, %v3438_v47  ;;  %v3660_v55 = vld [vmem:[#allocation5 + $0x350] sm:$0xf]  ;;  %v4339_v9 = vld [vmem:[#allocation5 + $0x354] sm:$0xf]  ;;  %p4793_p0 = scmp.ne.s32.totalorder %s4791_s4, %s4792_s19  ;;  %p4798_p4 = scmp.lt.s32.totalorder %s4796_s25, %s4792_s19 }
  0x7d   : > { %1623 = vmatpush.bf16.msrb.mxu0 %v3301_v59  ;;  %v3406_v59 = vld [vmem:[#allocation5 + $0x170] sm:$0xf0]  ;;  %v3661_v0 = vor.u32 %v4343_v56, %v3660_v55  ;;  %v3340_v11 = vld [vmem:[#allocation5 + $0xd0] sm:$0xf] }
  0x7e   : > { %v3409_v1 = vor.u32 %v4275_v57, %v3406_v59  ;;  %v3662_v10 = vld [vmem:[#allocation5 + $0x370] sm:$0xf0]  ;;  %v4263_v12 = vld [vmem:[#allocation5 + $0xec] sm:$0xf0]  ;;  %p4794_p1 = pnand %p4793_p0, %p5023_p5  ;;  %p4799_p7 = por %p4798_p4, %p4797_p3 }
  0x7f   : > { %1660 = vmatpush.bf16.msrb.mxu3 %v3625_v58  ;;  %1636 = vmatpush.bf16.msra.mxu1 %v3557_v2  ;;  %v3405_v58 = vor.u32 %v4279_v51, %v3404_v50  ;;  %v3697_v2 = vor.u32 %v4347_v60, %v3694_v61  ;;  %v3665_v16 = vor.u32 %v4339_v9, %v3662_v10  ;;  %v3596_v17 = vld [vmem:[#allocation5 + $0x2d0] sm:$0xf]  ;;  %v3342_v21 = vld [vmem:[#allocation5 + $0xf0] sm:$0xf0] }
  0x80   : > { %1649 = vmatpush.bf16.msra.mxu2 %v3305_v3  ;;  %v3628_v3 = vld [vmem:[#allocation5 + $0x310] sm:$0xf]  ;;  %v3341_v20 = vor.u32 %v4263_v12, %v3340_v11  ;;  %v4331_v22 = vld [vmem:[#allocation5 + $0x314] sm:$0xf]  ;;  %p4795_p2 = pneg %p4794_p1 }
  0x81   : > { %1624 = vmatpush.bf16.msrb.mxu0 %v3269_v7  ;;  %v3374_v7 = vld [vmem:[#allocation5 + $0x130] sm:$0xf0]  ;;  %v3629_v14 = vor.u32 %v4335_v4, %v3628_v3  ;;  %v4255_v25 = vld [vmem:[#allocation5 + $0xac] sm:$0xf0]  ;;  %v3478_v3 = vld [vmem:[#allocation5 + $0x1f8] sm:$0xf0] }
  0x82   : > { %v3377_v15 = vor.u32 %v4267_v5, %v3374_v7  ;;  %v3564_v27 = vld [vmem:[#allocation5 + $0x290] sm:$0xf]  ;;  %v4251_v32 = vld [vmem:[#allocation5 + $0x94] sm:$0xf]  ;;  %v3444_v5 = vld [vmem:[#allocation5 + $0x198] sm:$0xf]  ;;  %p4800_p8 = pnand %p4799_p7, %p4795_p2 }
  0x83   : > { %1661 = vmatpush.bf16.msrb.mxu3 %v3593_v6  ;;  %1637 = vmatpush.bf16.msra.mxu1 %v3525_v18  ;;  %v3373_v6 = vor.u32 %v4271_v63, %v3372_v62  ;;  %v4327_v18 = vld [vmem:[#allocation5 + $0x2ec] sm:$0xf0]  ;;  %v3310_v33 = vld [vmem:[#allocation5 + $0xb0] sm:$0xf0]  ;;  %v3732_v63 = vld [vmem:[#allocation5 + $0x3d8] sm:$0xf] }
  0x84   : > { %1650 = vmatpush.bf16.msra.mxu2 %v3273_v19  ;;  %v4259_v19 = vld [vmem:[#allocation5 + $0xd4] sm:$0xf]  ;;  %v3597_v26 = vor.u32 %v4327_v18, %v3596_v17  ;;  %v4319_v31 = vld [vmem:[#allocation5 + $0x2ac] sm:$0xf0]  ;;  %v3313_v41 = vor.u32 %v4251_v32, %v3310_v33  ;;  %v3446_v18 = vld [vmem:[#allocation5 + $0x1b8] sm:$0xf0] }
  0x85   : > { %1625 = vmatpush.bf16.msrb.mxu0 %v3237_v24  ;;  %v3308_v24 = vld [vmem:[#allocation5 + $0x90] sm:$0xf]  ;;  %v4323_v35 = vld [vmem:[#allocation5 + $0x2d4] sm:$0xf]  ;;  %v3414_v32 = vld [vmem:[#allocation5 + $0x178] sm:$0xf0] }
  0x86   : > { %v3309_v34 = vor.u32 %v4255_v25, %v3308_v24  ;;  %v3532_v40 = vld [vmem:[#allocation5 + $0x250] sm:$0xf]  ;;  %v4243_v44 = vld [vmem:[#allocation5 + $0x54] sm:$0xf]  ;;  %v4348_v33 = vld [vmem:[#allocation5 + $0x39c] sm:$0xf] }
  0x87   : > { %1662 = vmatpush.bf16.msrb.mxu3 %v3561_v23  ;;  %1638 = vmatpush.bf16.msra.mxu1 %v3493_v36  ;;  %v3630_v23 = vld [vmem:[#allocation5 + $0x330] sm:$0xf0]  ;;  %v3244_v49 = vld [vmem:[#allocation5 + $0x10] sm:$0xf] }
  0x88   : > { %1651 = vmatpush.bf16.msra.mxu2 %v3241_v37  ;;  %1626 = vmatmul.bf16.vlgmr.msrb.gmra.mxu0 %v5118_v13  ;;  %v3633_v29 = vor.u32 %v4331_v22, %v3630_v23  ;;  %v3598_v36 = vld [vmem:[#allocation5 + $0x2f0] sm:$0xf0]  ;;  %v3276_v37 = vld [vmem:[#allocation5 + $0x50] sm:$0xf]  ;;  %v4280_v22 = vld [vmem:[#allocation5 + $0x174] sm:$0xf0] }
  0x89   : > { %1670 = vmatpush.bf16.msra.mxu0 %v3469_v28  ;;  %v3345_v28 = vor.u32 %v4259_v19, %v3342_v21  ;;  %v3278_v45 = vld [vmem:[#allocation5 + $0x70] sm:$0xf0]  ;;  %v4239_v50 = vld [vmem:[#allocation5 + $0x2c] sm:$0xf0]  ;;  %v4356_v19 = vld [vmem:[#allocation5 + $0x3dc] sm:$0xf] }
  0x8a   : > { %1639 = vmatmul.bf16.vlgmr.msra.gmra.mxu1 %v5116_v8  ;;  %v4315_v47 = vld [vmem:[#allocation5 + $0x294] sm:$0xf]  ;;  %v3500_v55 = vld [vmem:[#allocation5 + $0x210] sm:$0xf]  ;;  %v3245_v57 = vor.u32 %v4239_v50, %v3244_v49  ;;  %v3412_v21 = vld [vmem:[#allocation5 + $0x158] sm:$0xf] }
  0x8b   : > { %1663 = vmatpush.bf16.msrb.mxu3 %v3529_v38  ;;  %1683 = vmatpush.bf16.msrb.mxu1 %v3725_v39  ;;  %v4247_v38 = vld [vmem:[#allocation5 + $0x6c] sm:$0xf0]  ;;  %v3565_v39 = vor.u32 %v4319_v31, %v3564_v27  ;;  %v3566_v48 = vld [vmem:[#allocation5 + $0x2b0] sm:$0xf0]  ;;  %v3668_v27 = vld [vmem:[#allocation5 + $0x358] sm:$0xf]  ;;  %v3413_v31 = vor.u32 %v4280_v22, %v3412_v21 }
  0x8c   : > { %1696 = vmatpush.bf16.msrb.mxu2 %v3473_v42  ;;  %v3601_v42 = vor.u32 %v4323_v35, %v3598_v36  ;;  %v3277_v46 = vor.u32 %v4247_v38, %v3276_v37  ;;  %v4303_v56 = vld [vmem:[#allocation5 + $0x22c] sm:$0xf0]  ;;  %v3246_v59 = vld [vmem:[#allocation5 + $0x30] sm:$0xf0]  ;;  %v3380_v35 = vld [vmem:[#allocation5 + $0x118] sm:$0xf] }
  0x8d   : > { %1671 = vmatpush.bf16.msra.mxu0 %v3437_v43  ;;  %1652 = vmatmul.bf16.vlgmr.msra.gmra.mxu2 %v5118_v13  ;;  %v4311_v43 = vld [vmem:[#allocation5 + $0x26c] sm:$0xf0]  ;;  %v4307_v60 = vld [vmem:[#allocation5 + $0x254] sm:$0xf]  ;;  %v4272_v36 = vld [vmem:[#allocation5 + $0x134] sm:$0xf0] }
  0x8e   : > { %v3533_v51 = vor.u32 %v4311_v43, %v3532_v40  ;;  %v3534_v62 = vld [vmem:[#allocation5 + $0x270] sm:$0xf0]  ;;  %v3636_v40 = vld [vmem:[#allocation5 + $0x318] sm:$0xf]  ;;  %v3381_v43 = vor.u32 %v4272_v36, %v3380_v35 }
  0x8f   : > { %1664 = vmatpush.bf16.msrb.mxu3 %v3497_v52  ;;  %1684 = vmatpush.bf16.msrb.mxu1 %v3693_v53  ;;  %v3476_v52 = vld [vmem:[#allocation5 + $0x1d8] sm:$0xf]  ;;  %v3537_v7 = vor.u32 %v4307_v60, %v3534_v62  ;;  %v4299_v10 = vld [vmem:[#allocation5 + $0x214] sm:$0xf] }
  0x90   : > { %1697 = vmatpush.bf16.msrb.mxu2 %v3441_v54  ;;  %v4296_v53 = vld [vmem:[#allocation5 + $0x1f4] sm:$0xf0]  ;;  %v3281_v54 = vor.u32 %v4243_v44, %v3278_v45  ;;  %v3502_v11 = vld [vmem:[#allocation5 + $0x230] sm:$0xf0]  ;;  %v3382_v44 = vld [vmem:[#allocation5 + $0x138] sm:$0xf0] }
  0x91   : > { %1672 = vmatpush.bf16.msra.mxu0 %v3405_v58  ;;  %v4235_v58 = vld [vmem:[#allocation5 + $0x14] sm:$0xf]  ;;  %v3477_v61 = vor.u32 %v4296_v53, %v3476_v52  ;;  %v3505_v23 = vor.u32 %v4299_v10, %v3502_v11  ;;  %v4340_v45 = vld [vmem:[#allocation5 + $0x35c] sm:$0xf]  ;;  %v3604_v52 = vld [vmem:[#allocation5 + $0x2d8] sm:$0xf] }
  0x92   : > { %1665 = vmatmul.bf16.vlgmr.msrb.gmra.mxu3 %v5116_v8  ;;  %v3249_v4 = vor.u32 %v4235_v58, %v3246_v59  ;;  %v4328_v53 = vld [vmem:[#allocation5 + $0x2f4] sm:$0xf0] }
  0x93   : > { %1709 = vmatpush.bf16.msra.mxu3 %v3729_v30  ;;  %1685 = vmatpush.bf16.msrb.mxu1 %v3661_v0  ;;  %v3569_v30 = vor.u32 %v4315_v47, %v3566_v48  ;;  %v4360_v0 = vld [vmem:[#allocation5 + $0x3f4] sm:$0xf0]  ;;  %v3605_v60 = vor.u32 %v4328_v53, %v3604_v52 }
  0x94   : > { %1698 = vmatpush.bf16.msrb.mxu2 %v3409_v1  ;;  %v3501_v1 = vor.u32 %v4303_v56, %v3500_v55  ;;  %v3733_v9 = vor.u32 %v4360_v0, %v3732_v63  ;;  %v3348_v47 = vld [vmem:[#allocation5 + $0xd8] sm:$0xf]  ;;  %v3350_v55 = vld [vmem:[#allocation5 + $0xf8] sm:$0xf0] }
  0x95   : > { %1673 = vmatpush.bf16.msra.mxu0 %v3373_v6  ;;  %v4288_v6 = vld [vmem:[#allocation5 + $0x1b4] sm:$0xf0]  ;;  %v4332_v56 = vld [vmem:[#allocation5 + $0x31c] sm:$0xf] }
  0x96   : > { %v3445_v17 = vor.u32 %v4288_v6, %v3444_v5  ;;  %v4264_v48 = vld [vmem:[#allocation5 + $0xf4] sm:$0xf0]  ;;  %v3606_v5 = vld [vmem:[#allocation5 + $0x2f8] sm:$0xf0] }
  0x97   : > { %1710 = vmatpush.bf16.msra.mxu3 %v3697_v2  ;;  %1686 = vmatpush.bf16.msrb.mxu1 %v3629_v14  ;;  %v4292_v2 = vld [vmem:[#allocation5 + $0x1dc] sm:$0xf]  ;;  %v3700_v14 = vld [vmem:[#allocation5 + $0x398] sm:$0xf] }
  0x98   : > { %1699 = vmatpush.bf16.msrb.mxu2 %v3377_v15  ;;  %v3481_v12 = vor.u32 %v4292_v2, %v3478_v3  ;;  %v4352_v15 = vld [vmem:[#allocation5 + $0x3b4] sm:$0xf0]  ;;  %v3318_v3 = vld [vmem:[#allocation5 + $0xb8] sm:$0xf0] }
  0x99   : > { %1674 = vmatpush.bf16.msra.mxu0 %v3341_v20  ;;  %v3734_v20 = vld [vmem:[#allocation5 + $0x3f8] sm:$0xf0]  ;;  %v3701_v24 = vor.u32 %v4352_v15, %v3700_v14  ;;  %v3316_v58 = vld [vmem:[#allocation5 + $0x98] sm:$0xf] }
  0x9a   : > { %v4256_v59 = vld [vmem:[#allocation5 + $0xb4] sm:$0xf0]  ;;  %v4244_v15 = vld [vmem:[#allocation5 + $0x5c] sm:$0xf] }
  0x9b   : > { %1711 = vmatpush.bf16.msra.mxu3 %v3665_v16  ;;  %1687 = vmatpush.bf16.msrb.mxu1 %v3597_v26  ;;  %v4284_v16 = vld [vmem:[#allocation5 + $0x19c] sm:$0xf]  ;;  %v3737_v26 = vor.u32 %v4356_v19, %v3734_v20  ;;  %v3572_v63 = vld [vmem:[#allocation5 + $0x298] sm:$0xf]  ;;  %v3317_v2 = vor.u32 %v4256_v59, %v3316_v58  ;;  %v4393_v58 = vld [vmem:[%s5435_s7] sm:$0xff] }
  0x9c   : > { %1700 = vmatpush.bf16.msrb.mxu2 %v3345_v28  ;;  %v3449_v25 = vor.u32 %v4284_v16, %v3446_v18  ;;  %v4344_v28 = vld [vmem:[#allocation5 + $0x374] sm:$0xf0]  ;;  %v4316_v18 = vld [vmem:[#allocation5 + $0x29c] sm:$0xf] }
  0x9d   : > { %1675 = vmatpush.bf16.msra.mxu0 %v3309_v34  ;;  %v3702_v34 = vld [vmem:[#allocation5 + $0x3b8] sm:$0xf0]  ;;  %v3669_v37 = vor.u32 %v4344_v28, %v3668_v27  ;;  %v4320_v0 = vld [vmem:[#allocation5 + $0x2b4] sm:$0xf0] }
  0x9e   : > { %v3284_v6 = vld [vmem:[#allocation5 + $0x58] sm:$0xf]  ;;  %v3574_v19 = vld [vmem:[#allocation5 + $0x2b8] sm:$0xf0] }
  0x9f   : > { %1712 = vmatpush.bf16.msra.mxu3 %v3633_v29  ;;  %1688 = vmatpush.bf16.msrb.mxu1 %v3565_v39  ;;  %v4276_v29 = vld [vmem:[#allocation5 + $0x15c] sm:$0xf]  ;;  %v3705_v39 = vor.u32 %v4348_v33, %v3702_v34  ;;  %v4312_v14 = vld [vmem:[#allocation5 + $0x274] sm:$0xf0] }
  0xa0   : > { %1701 = vmatpush.bf16.msrb.mxu2 %v3313_v41  ;;  %v3417_v38 = vor.u32 %v4276_v29, %v3414_v32  ;;  %v4336_v41 = vld [vmem:[#allocation5 + $0x334] sm:$0xf0]  ;;  %v4236_v28 = vld [vmem:[#allocation5 + $0x1c] sm:$0xf] }
  0xa1   : > { %1676 = vmatpush.bf16.msra.mxu0 %v3277_v46  ;;  %v3670_v46 = vld [vmem:[#allocation5 + $0x378] sm:$0xf0]  ;;  %v3637_v49 = vor.u32 %v4336_v41, %v3636_v40  ;;  %v3252_v20 = vld [vmem:[#allocation5 + $0x18] sm:$0xf]  ;;  %v4398_v41 = vld [vmem:[%s5435_s7 + $0x28] sm:$0xff] }
  0xa2   : > { %v4240_v21 = vld [vmem:[#allocation5 + $0x34] sm:$0xf0]  ;;  %v3254_v29 = vld [vmem:[#allocation5 + $0x38] sm:$0xf0] }
  0xa3   : > { %1713 = vmatpush.bf16.msra.mxu3 %v3601_v42  ;;  %1689 = vmatpush.bf16.msrb.mxu1 %v3533_v51  ;;  %v4268_v42 = vld [vmem:[#allocation5 + $0x11c] sm:$0xf]  ;;  %v3673_v51 = vor.u32 %v4340_v45, %v3670_v46  ;;  %v3253_v27 = vor.u32 %v4240_v21, %v3252_v20  ;;  %v3257_v35 = vor.u32 %v4236_v28, %v3254_v29  ;;  %v4407_v45 = vld [vmem:[%s5435_s7 + $0x70] sm:$0xff] }
  0xa4   : > { %1702 = vmatpush.bf16.msrb.mxu2 %v3281_v54  ;;  %v3385_v50 = vor.u32 %v4268_v42, %v3382_v44  ;;  %v4260_v54 = vld [vmem:[#allocation5 + $0xdc] sm:$0xf]  ;;  %v4397_v44 = vld [vmem:[%s5435_s7 + $0x20] sm:$0xff] }
  0xa5   : > { %1677 = vmatpush.bf16.msra.mxu0 %v3245_v57  ;;  %v3638_v57 = vld [vmem:[#allocation5 + $0x338] sm:$0xf0] }
  0xa6   : > { %v3641_v62 = vor.u32 %v4332_v56, %v3638_v57  ;;  %v3542_v32 = vld [vmem:[#allocation5 + $0x278] sm:$0xf0]  ;;  %v4394_v56 = vld [vmem:[%s5435_s7 + $0x8] sm:$0xff] }
  0xa7   : > { %1714 = vmatpush.bf16.msra.mxu3 %v3569_v30  ;;  %1690 = vmatpush.bf16.msrb.mxu1 %v3501_v1  ;;  %v3349_v30 = vor.u32 %v4264_v48, %v3348_v47  ;;  %v4252_v1 = vld [vmem:[#allocation5 + $0x9c] sm:$0xf]  ;;  %v4406_v48 = vld [vmem:[%s5435_s7 + $0x68] sm:$0xff] }
  0xa8   : > { %1703 = vmatpush.bf16.msrb.mxu2 %v3249_v4  ;;  %1678 = vmatmul.bf16.vlgmr.msra.gmra.mxu0 %v5118_v13  ;;  %v4324_v4 = vld [vmem:[#allocation5 + $0x2dc] sm:$0xf]  ;;  %v3321_v10 = vor.u32 %v4252_v1, %v3318_v3  ;;  %v4411_v1 = vld [vmem:[%s5435_s7 + $0x90] sm:$0xff]  ;;  %v4402_v3 = vld [vmem:[%s5435_s7 + $0x48] sm:$0xff] }
  0xa9   : > { %1722 = vmatpush.bf16.msrb.mxu0 %v3477_v61  ;;  %v3353_v61 = vor.u32 %v4260_v54, %v3350_v55  ;;  %v3609_v11 = vor.u32 %v4324_v4, %v3606_v5  ;;  %v4400_v33 = vld [vmem:[%s5435_s7 + $0x38] sm:$0xff]  ;;  %v4413_v54 = vld [vmem:[%s5435_s7 + $0xa0] sm:$0xff]  ;;  %v4431_v4 = vld [vmem:[%s5435_s7 + $0x130] sm:$0xff] }
  0xaa   : > { %1691 = vmatmul.bf16.vlgmr.msrb.gmra.mxu1 %v5116_v8  ;;  %v4408_v42 = vld [vmem:[%s5435_s7 + $0x78] sm:$0xff] }
  0xab   : > { %1715 = vmatpush.bf16.msra.mxu3 %v3537_v7  ;;  %1735 = vmatpush.bf16.msra.mxu1 %v3733_v9  ;;  %v4248_v7 = vld [vmem:[#allocation5 + $0x74] sm:$0xf0]  ;;  %v3573_v9 = vor.u32 %v4320_v0, %v3572_v63 }
  0xac   : > { %1748 = vmatpush.bf16.msra.mxu2 %v3481_v12  ;;  %v3540_v12 = vld [vmem:[#allocation5 + $0x258] sm:$0xf]  ;;  %v3285_v16 = vor.u32 %v4248_v7, %v3284_v6  ;;  %v4430_v6 = vld [vmem:[%s5435_s7 + $0x128] sm:$0xff]  ;;  %v5231_v7 = vld [vmem:[%s5433_s5] sm:$0xff] }
  0xad   : > { %1723 = vmatpush.bf16.msrb.mxu0 %v3445_v17  ;;  %1704 = vmatmul.bf16.vlgmr.msrb.gmra.mxu2 %v5118_v13  ;;  %v3286_v17 = vld [vmem:[#allocation5 + $0x78] sm:$0xf0]  ;;  %v3541_v22 = vor.u32 %v4312_v14, %v3540_v12  ;;  %v904_v21 = vperm.slane %v5231_v7, 1 }
  0xae   : > { %v4396_v47 = vld [vmem:[%s5435_s7 + $0x18] sm:$0xff] }
  0xaf   : > { %1716 = vmatpush.bf16.msra.mxu3 %v3505_v23  ;;  %1736 = vmatpush.bf16.msra.mxu1 %v3701_v24  ;;  %v3289_v23 = vor.u32 %v4244_v15, %v3286_v17  ;;  %v3577_v24 = vor.u32 %v4316_v18, %v3574_v19  ;;  %v4424_v52 = vld [vmem:[%s5435_s7 + $0xf8] sm:$0xff]  ;;  %v4410_v15 = vld [vmem:[%s5435_s7 + $0x88] sm:$0xff]  ;;  %v4429_v19 = vld [vmem:[%s5435_s7 + $0x120] sm:$0xff] }
  0xb0   : > { %1749 = vmatpush.bf16.msra.mxu2 %v3449_v25  ;;  %v3508_v25 = vld [vmem:[#allocation5 + $0x218] sm:$0xf] }
  0xb1   : > { %1724 = vmatpush.bf16.msrb.mxu0 %v3413_v31  ;;  %v4308_v31 = vld [vmem:[#allocation5 + $0x25c] sm:$0xf] }
  0xb2   : > { %1717 = vmatmul.bf16.vlgmr.msra.gmra.mxu3 %v5116_v8  ;;  %v3545_v36 = vor.u32 %v4308_v31, %v3542_v32  ;;  %v4404_v57 = vld [vmem:[%s5435_s7 + $0x58] sm:$0xff] }
  0xb3   : > { %1761 = vmatpush.bf16.msrb.mxu3 %v3737_v26  ;;  %1737 = vmatpush.bf16.msra.mxu1 %v3669_v37  ;;  %v4304_v26 = vld [vmem:[#allocation5 + $0x234] sm:$0xf0]  ;;  %v4300_v37 = vld [vmem:[#allocation5 + $0x21c] sm:$0xf] }
  0xb4   : > { %1750 = vmatpush.bf16.msra.mxu2 %v3417_v38  ;;  %v3509_v34 = vor.u32 %v4304_v26, %v3508_v25  ;;  %v3510_v38 = vld [vmem:[#allocation5 + $0x238] sm:$0xf0] }
  0xb5   : > { %1725 = vmatpush.bf16.msrb.mxu0 %v3381_v43  ;;  %v3513_v40 = vor.u32 %v4300_v37, %v3510_v38  ;;  %v4416_v43 = vld [vmem:[%s5435_s7 + $0xb8] sm:$0xff]  ;;  %v4417_v38 = vld [vmem:[%s5435_s7 + $0xc0] sm:$0xff] }
  0xb6   : > { %v4432_v0 = vld [vmem:[%s5435_s7 + $0x138] sm:$0xff] }
  0xb7   : > { %1762 = vmatpush.bf16.msrb.mxu3 %v3705_v39  ;;  %1738 = vmatpush.bf16.msra.mxu1 %v3637_v49  ;;  %v4399_v39 = vld [vmem:[%s5435_s7 + $0x30] sm:$0xff]  ;;  %v4440_v17 = vld [vmem:[%s5435_s7 + $0x178] sm:$0xff] }
  0xb8   : > { %1751 = vmatpush.bf16.msra.mxu2 %v3385_v50  ;;  %v4395_v49 = vld [vmem:[%s5435_s7 + $0x10] sm:$0xff]  ;;  %v4428_v26 = vld [vmem:[%s5435_s7 + $0x118] sm:$0xff] }
  0xb9   : > { %1726 = vmatpush.bf16.msrb.mxu0 %v3349_v30  ;;  %v4423_v30 = vld [vmem:[%s5435_s7 + $0xf0] sm:$0xff] }
  0xbb   : > { %1763 = vmatpush.bf16.msrb.mxu3 %v3673_v51  ;;  %1739 = vmatpush.bf16.msra.mxu1 %v3605_v60  ;;  %v4414_v51 = vld [vmem:[%s5435_s7 + $0xa8] sm:$0xff]  ;;  %v4403_v60 = vld [vmem:[%s5435_s7 + $0x50] sm:$0xff] }
  0xbc   : > { %1752 = vmatpush.bf16.msra.mxu2 %v3353_v61  ;;  %v4412_v61 = vld [vmem:[%s5435_s7 + $0x98] sm:$0xff] }
  0xbd   : > { %1727 = vmatpush.bf16.msrb.mxu0 %v3317_v2  ;;  %v4421_v2 = vld [vmem:[%s5435_s7 + $0xe0] sm:$0xff] }
  0xbf   : > { %1764 = vmatpush.bf16.msrb.mxu3 %v3641_v62  ;;  %1740 = vmatpush.bf16.msra.mxu1 %v3573_v9  ;;  %v4422_v62 = vld [vmem:[%s5435_s7 + $0xe8] sm:$0xff]  ;;  %v903_v9 = vperm.slane %v5231_v7, 0 }
  0xc0   : > { %1753 = vmatpush.bf16.msra.mxu2 %v3321_v10  ;;  %v4401_v10 = vld [vmem:[%s5435_s7 + $0x40] sm:$0xff] }
  0xc1   : > { %1728 = vmatpush.bf16.msrb.mxu0 %v3285_v16  ;;  %v4420_v16 = vld [vmem:[%s5435_s7 + $0xd8] sm:$0xff] }
  0xc3   : > { %1765 = vmatpush.bf16.msrb.mxu3 %v3609_v11  ;;  %1741 = vmatpush.bf16.msra.mxu1 %v3541_v22  ;;  %v4409_v22 = vld [vmem:[%s5435_s7 + $0x80] sm:$0xff] }
  0xc4   : > { %1754 = vmatpush.bf16.msra.mxu2 %v3289_v23  ;;  %v4419_v23 = vld [vmem:[%s5435_s7 + $0xd0] sm:$0xff] }
  0xc5   : > { %1729 = vmatpush.bf16.msrb.mxu0 %v3253_v27 }
  0xc7   : > { %1766 = vmatpush.bf16.msrb.mxu3 %v3577_v24  ;;  %1742 = vmatpush.bf16.msra.mxu1 %v3509_v34  ;;  %v5160_v46 = vpop.f32.mrf.mxu1  ;;  %v4439_v24 = vld [vmem:[%s5435_s7 + $0x170] sm:$0xff]  ;;  %v4438_v34 = vld [vmem:[%s5435_s7 + $0x168] sm:$0xff] }
  0xc8   : > { %1755 = vmatpush.bf16.msra.mxu2 %v3257_v35  ;;  %1730 = vmatmul.bf16.vlgmr.msrb.gmra.mxu0 %v5118_v13  ;;  %v4427_v35 = vld [vmem:[%s5435_s7 + $0x110] sm:$0xff] }
  0xc9   : > { %2366 = vmatpush.bf16.msra.mxu0 %v4400_v33  ;;  %v4418_v33 = vld [vmem:[%s5435_s7 + $0xc8] sm:$0xff] }
  0xca   : > { %1743 = vmatmul.bf16.vlgmr.msra.gmra.mxu1 %v5116_v8 }
  0xcb   : > { %1767 = vmatpush.bf16.msrb.mxu3 %v3545_v36  ;;  %1756 = vmatmul.bf16.vlgmr.msra.gmra.mxu2 %v5118_v13  ;;  %v4415_v13 = vld [vmem:[%s5435_s7 + $0xb0] sm:$0xff] }
  0xcc   : > { %2379 = vmatpush.bf16.msrb.mxu1 %v4408_v42  ;;  %2392 = vmatpush.bf16.msrb.mxu2 %v4416_v43 }
  0xcd   : > { %2367 = vmatpush.bf16.msra.mxu0 %v4399_v39  ;;  %v5171_v50 = vpop.f32.mrf.mxu3  ;;  %v4437_v39 = vld [vmem:[%s5435_s7 + $0x160] sm:$0xff] }
  0xcf   : > { %1768 = vmatpush.bf16.msrb.mxu3 %v3513_v40  ;;  %v736_v55 = vpop.f32.mrf.mxu1 }
  0xd0   : > { %2380 = vmatpush.bf16.msrb.mxu1 %v4407_v45  ;;  %2393 = vmatpush.bf16.msrb.mxu2 %v4415_v13  ;;  %v5182_v53 = vpop.f32.mrf.mxu2  ;;  %v4425_v45 = vld [vmem:[%s5435_s7 + $0x100] sm:$0xff]  ;;  %v4448_v13 = vld [vmem:[%s5435_s7 + $0x1b8] sm:$0xff]  ;;  %v4366_v55 = vld [vmem:[#allocation7 + $0x28] sm:$0xff] }
  0xd1   : > { %2368 = vmatpush.bf16.msra.mxu0 %v4398_v41  ;;  %v4426_v41 = vld [vmem:[%s5435_s7 + $0x108] sm:$0xff] }
  0xd2   : > { %1769 = vmatmul.bf16.vlgmr.msrb.gmra.mxu3 %v5116_v8  ;;  %v4405_v8 = vld [vmem:[%s5435_s7 + $0x60] sm:$0xff] }
  0xd3   : > { %2405 = vmatpush.bf16.msra.mxu3 %v4424_v52  ;;  %v4434_v52 = vld [vmem:[%s5435_s7 + $0x148] sm:$0xff] }
  0xd4   : > { %2381 = vmatpush.bf16.msrb.mxu1 %v4406_v48  ;;  %2394 = vmatpush.bf16.msrb.mxu2 %v4414_v51  ;;  %v4447_v48 = vld [vmem:[%s5435_s7 + $0x1b0] sm:$0xff] }
  0xd5   : > { %2369 = vmatpush.bf16.msra.mxu0 %v4397_v44  ;;  %v723_v59 = vpop.f32.mrf.mxu3  ;;  %v4436_v44 = vld [vmem:[%s5435_s7 + $0x158] sm:$0xff]  ;;  %v4367_v51 = vld [vmem:[#allocation7 + $0x30] sm:$0xff] }
  0xd6   : > { %v4456_v59 = vld [vmem:[%s5435_s7 + $0x1f8] sm:$0xff] }
  0xd7   : > { %2406 = vmatpush.bf16.msra.mxu3 %v4423_v30  ;;  %v4446_v30 = vld [vmem:[%s5435_s7 + $0x1a8] sm:$0xff] }
  0xd8   : > { %2382 = vmatpush.bf16.msrb.mxu1 %v4405_v8  ;;  %2395 = vmatpush.bf16.msrb.mxu2 %v4413_v54  ;;  %v749_v63 = vpop.f32.mrf.mxu2  ;;  %v4435_v8 = vld [vmem:[%s5435_s7 + $0x150] sm:$0xff]  ;;  %v905_v54 = vperm.slane %v5231_v7, 2 }
  0xd9   : > { %2370 = vmatpush.bf16.msra.mxu0 %v4396_v47  ;;  %v4368_v47 = vld [vmem:[#allocation7 + $0x38] sm:$0xff]  ;;  %v4365_v63 = vld [vmem:[#allocation7 + $0x20] sm:$0xff] }
  0xdb   : > { %2407 = vmatpush.bf16.msra.mxu3 %v4422_v62  ;;  %v4445_v62 = vld [vmem:[%s5435_s7 + $0x1a0] sm:$0xff] }
  0xdc   : > { %2383 = vmatpush.bf16.msrb.mxu1 %v4404_v57  ;;  %2396 = vmatpush.bf16.msrb.mxu2 %v4412_v61 }
  0xdd   : > { %2371 = vmatpush.bf16.msra.mxu0 %v4395_v49  ;;  %v5223_v5 = vpop.f32.mrf.mxu3 }
  0xdf   : > { %2408 = vmatpush.bf16.msra.mxu3 %v4421_v2  ;;  %v4455_v2 = vld [vmem:[%s5435_s7 + $0x1f0] sm:$0xff] }
  0xe0   : > { %2384 = vmatpush.bf16.msrb.mxu1 %v4403_v60  ;;  %2397 = vmatpush.bf16.msrb.mxu2 %v4411_v1  ;;  %v4376_v60 = vld [vmem:[#allocation7 + $0x78] sm:$0xff]  ;;  %v906_v1 = vperm.slane %v5231_v7, 3 }
  0xe1   : > { %2372 = vmatpush.bf16.msra.mxu0 %v4394_v56  ;;  %v4433_v56 = vld [vmem:[%s5435_s7 + $0x140] sm:$0xff] }
  0xe3   : > { %2409 = vmatpush.bf16.msra.mxu3 %v4420_v16  ;;  %v4454_v16 = vld [vmem:[%s5435_s7 + $0x1e8] sm:$0xff] }
  0xe4   : > { %2385 = vmatpush.bf16.msrb.mxu1 %v4402_v3  ;;  %2398 = vmatpush.bf16.msrb.mxu2 %v4410_v15  ;;  %v4375_v3 = vld [vmem:[#allocation7 + $0x70] sm:$0xff] }
  0xe5   : > { %2373 = vmatpush.bf16.msra.mxu0 %v4393_v58  ;;  %v762_v12 = vpop.f32.mrf.mxu3  ;;  %v1575_v14 = vpop.f32.mrf.mxu0 }
  0xe6   : > { %v1576_v18 = vadd.f32 %v1575_v14, %v903_v9  ;;  %v4364_v9 = vld [vmem:[#allocation7 + $0x18] sm:$0xff] }
  0xe7   : > { %v1588_v11 = vpop.f32.mrf.mxu1  ;;  %2410 = vmatpush.bf16.msra.mxu3 %v4419_v23  ;;  %v4373_v23 = vld [vmem:[#allocation7 + $0x60] sm:$0xff] }
  0xe8   : > { %2386 = vmatpush.bf16.msrb.mxu1 %v4401_v10  ;;  %v1589_v20 = vadd.f32 %v1588_v11, %v1576_v18  ;;  %2399 = vmatpush.bf16.msrb.mxu2 %v4409_v22  ;;  %v4443_v18 = vld [vmem:[%s5435_s7 + $0x190] sm:$0xff]  ;;  %v4453_v22 = vld [vmem:[%s5435_s7 + $0x1e0] sm:$0xff] }
  0xe9   : > { %2418 = vmatpush.bf16.msrb.mxu0 %v4432_v0 }
  0xea   : > { %v1774_v25 = vmax.f32 %v1589_v20, 0.0 }
  0xeb   : > { %2411 = vmatpush.bf16.msra.mxu3 %v4418_v33  ;;  %v4361_v33 = vld [vmem:[#allocation7] sm:$0xff] }
  0xec   : > { %2431 = vmatpush.bf16.msra.mxu1 %v4440_v17  ;;  %v1782_v28 = vpack.c.bf16 %v1774_v25, %v1774_v25  ;;  %2444 = vmatpush.bf16.msra.mxu2 %v4448_v13  ;;  %v4374_v17 = vld [vmem:[#allocation7 + $0x68] sm:$0xff]  ;;  %v4369_v13 = vld [vmem:[#allocation7 + $0x40] sm:$0xff] }
  0xed   : > { %2419 = vmatpush.bf16.msrb.mxu0 %v4431_v4  ;;  %v1577_v32 = vpop.f32.mrf.mxu0  ;;  %v4444_v4 = vld [vmem:[%s5435_s7 + $0x198] sm:$0xff]  ;;  %v4362_v25 = vld [vmem:[#allocation7 + $0x8] sm:$0xff] }
  0xee   : > { %2374 = vmatmul.bf16.vlgmr.msra.gmra.mxu0 %v1782_v28  ;;  %v4441_v32 = vld [vmem:[%s5435_s7 + $0x180] sm:$0xff] }
  0xef   : > { %v1590_v31 = vpop.f32.mrf.mxu1  ;;  %2412 = vmatpush.bf16.msra.mxu3 %v4417_v38  ;;  %v4383_v38 = vld [vmem:[#allocation7 + $0xb0] sm:$0xff] }
  0xf0   : > { %v1601_v27 = vpop.f32.mrf.mxu2  ;;  %2432 = vmatpush.bf16.msra.mxu1 %v4439_v24  ;;  %2445 = vmatpush.bf16.msra.mxu2 %v4447_v48  ;;  %v4442_v24 = vld [vmem:[%s5435_s7 + $0x188] sm:$0xff]  ;;  %v4372_v31 = vld [vmem:[#allocation7 + $0x58] sm:$0xff] }
  0xf1   : > { %2420 = vmatpush.bf16.msrb.mxu0 %v4430_v6  ;;  %v1602_v29 = vadd.f32 %v1601_v27, %v904_v21  ;;  %v4392_v48 = vld [vmem:[#allocation7 + $0xf8] sm:$0xff] }
  0xf3   : > { %2457 = vmatpush.bf16.msrb.mxu3 %v4456_v59 }
  0xf4   : > { %2433 = vmatpush.bf16.msra.mxu1 %v4438_v34  ;;  %2446 = vmatpush.bf16.msra.mxu2 %v4446_v30  ;;  %v4384_v34 = vld [vmem:[#allocation7 + $0xb8] sm:$0xff]  ;;  %v908_v30 = vperm.slane %v5231_v7, 5 }
  0xf5   : > { %2421 = vmatpush.bf16.msrb.mxu0 %v4429_v19  ;;  %v1614_v36 = vpop.f32.mrf.mxu3  ;;  %v4363_v19 = vld [vmem:[#allocation7 + $0x10] sm:$0xff] }
  0xf6   : > { %v1615_v37 = vadd.f32 %v1614_v36, %v1602_v29  ;;  %v4452_v29 = vld [vmem:[%s5435_s7 + $0x1d8] sm:$0xff]  ;;  %v4451_v36 = vld [vmem:[%s5435_s7 + $0x1d0] sm:$0xff] }
  0xf7   : > { %2458 = vmatpush.bf16.msrb.mxu3 %v4455_v2 }
  0xf8   : > { %v1775_v40 = vmax.f32 %v1615_v37, 0.0  ;;  %v1603_v42 = vpop.f32.mrf.mxu2  ;;  %2434 = vmatpush.bf16.msra.mxu1 %v4437_v39  ;;  %2447 = vmatpush.bf16.msra.mxu2 %v4445_v62  ;;  %v4371_v37 = vld [vmem:[#allocation7 + $0x50] sm:$0xff]  ;;  %v907_v39 = vperm.slane %v5231_v7, 4 }
  0xf9   : > { %2422 = vmatpush.bf16.msrb.mxu0 %v4428_v26  ;;  %v4382_v42 = vld [vmem:[#allocation7 + $0xa8] sm:$0xff] }
  0xfa   : > { %v1783_v43 = vpack.c.bf16 %v1775_v40, %v1775_v40  ;;  %v4450_v40 = vld [vmem:[%s5435_s7 + $0x1c8] sm:$0xff] }
  0xfb   : > { %2459 = vmatpush.bf16.msrb.mxu3 %v4454_v16  ;;  %v4387_v16 = vld [vmem:[#allocation7 + $0xd0] sm:$0xff] }
  0xfc   : > { %2387 = vmatmul.bf16.vlgmr.msrb.gmra.mxu1 %v1783_v43  ;;  %2448 = vmatpush.bf16.msra.mxu2 %v4444_v4  ;;  %v4378_v4 = vld [vmem:[#allocation7 + $0x88] sm:$0xff] }
  0xfd   : > { %2423 = vmatpush.bf16.msrb.mxu0 %v4427_v35  ;;  %v1616_v49 = vpop.f32.mrf.mxu3  ;;  %2435 = vmatpush.bf16.msra.mxu1 %v4436_v44 }
  0xff   : > { %2460 = vmatpush.bf16.msrb.mxu3 %v4453_v22 }
 0x100   : > { %2449 = vmatpush.bf16.msra.mxu2 %v4443_v18 }
 0x101   : > { %2424 = vmatpush.bf16.msrb.mxu0 %v4426_v41  ;;  %2436 = vmatpush.bf16.msra.mxu1 %v4435_v8  ;;  %v4370_v41 = vld [vmem:[#allocation7 + $0x48] sm:$0xff]  ;;  %v4381_v8 = vld [vmem:[#allocation7 + $0xa0] sm:$0xff] }
 0x103   : > { %2461 = vmatpush.bf16.msrb.mxu3 %v4452_v29 }
 0x104   : > { %2450 = vmatpush.bf16.msra.mxu2 %v4442_v24 }
 0x105   : > { %2425 = vmatpush.bf16.msrb.mxu0 %v4425_v45  ;;  %2437 = vmatpush.bf16.msra.mxu1 %v4434_v52  ;;  %v1627_v57 = vpop.f32.mrf.mxu0  ;;  %v4449_v45 = vld [vmem:[%s5435_s7 + $0x1c0] sm:$0xff]  ;;  %v4391_v52 = vld [vmem:[#allocation7 + $0xf0] sm:$0xff] }
 0x106   : > { %v1628_v61 = vadd.f32 %v1627_v57, %v905_v54 }
 0x107   : > { %v1640_v58 = vpop.f32.mrf.mxu1  ;;  %2462 = vmatpush.bf16.msrb.mxu3 %v4451_v36 }
 0x108   : > { %v1641_v0 = vadd.f32 %v1640_v58, %v1628_v61  ;;  %2451 = vmatpush.bf16.msra.mxu2 %v4441_v32 }
 0x109   : > { %2662 = vmatpush.bf16.msra.mxu0 %v4368_v47  ;;  %2438 = vmatpush.bf16.msra.mxu1 %v4433_v56  ;;  %v5350_v56 = vld [vmem:[%s5431_s3] sm:$0xf] }
 0x10a   : > { %v1776_v6 = vmax.f32 %v1641_v0, 0.0  ;;  %v660_v61 = vperm.slane %v5350_v56, 0  ;;  %v661_v18 = vperm.slane %v5350_v56, 1 }
 0x10b   : > { %2463 = vmatpush.bf16.msrb.mxu3 %v4450_v40 }
 0x10c   : > { %v1784_v10 = vpack.c.bf16 %v1776_v6, %v1776_v6  ;;  %v722_v2 = vadd.f32 %v5171_v50, %v660_v61  ;;  %v4386_v50 = vld [vmem:[#allocation7 + $0xc8] sm:$0xff]  ;;  %v4463_v61 = vld [vmem:[#allocation8 + $0x30] sm:$0xff] }
 0x10d   : > { %2663 = vmatpush.bf16.msra.mxu0 %v4367_v51  ;;  %2675 = vmatpush.bf16.msrb.mxu1 %v4376_v60  ;;  %v1629_v14 = vpop.f32.mrf.mxu0  ;;  %v4390_v60 = vld [vmem:[#allocation7 + $0xe8] sm:$0xff] }
 0x10e   : > { %2400 = vmatmul.bf16.vlgmr.msrb.gmra.mxu2 %v1784_v10  ;;  %v4388_v10 = vld [vmem:[#allocation7 + $0xd8] sm:$0xff]  ;;  %v4377_v14 = vld [vmem:[#allocation7 + $0x80] sm:$0xff] }
 0x10f   : > { %v1642_v15 = vpop.f32.mrf.mxu1  ;;  %2688 = vmatpush.bf16.msrb.mxu2 %v4384_v34  ;;  %2464 = vmatpush.bf16.msrb.mxu3 %v4449_v45  ;;  %v662_v34 = vperm.slane %v5350_v56, 2 }
 0x110   : > { %v1653_v11 = vpop.f32.mrf.mxu2 }
 0x111   : > { %2664 = vmatpush.bf16.msra.mxu0 %v4366_v55  ;;  %2676 = vmatpush.bf16.msrb.mxu1 %v4375_v3  ;;  %v1654_v12 = vadd.f32 %v1653_v11, %v906_v1  ;;  %v4380_v55 = vld [vmem:[#allocation7 + $0x98] sm:$0xff]  ;;  %v4389_v1 = vld [vmem:[#allocation7 + $0xe0] sm:$0xff]  ;;  %v764_v11 = vmax.f32 %v722_v2, 0.0 }
 0x112   : > { %v4460_v2 = vld [vmem:[#allocation8 + $0x18] sm:$0xff] }
 0x113   : > { %2689 = vmatpush.bf16.msrb.mxu2 %v4383_v38 }
 0x115   : > { %2665 = vmatpush.bf16.msra.mxu0 %v4365_v63  ;;  %v1666_v20 = vpop.f32.mrf.mxu3  ;;  %2677 = vmatpush.bf16.msrb.mxu1 %v4374_v17  ;;  %v4379_v63 = vld [vmem:[#allocation7 + $0x90] sm:$0xff]  ;;  %v768_v17 = vpack.c.bf16 %v764_v11, %v764_v11  ;;  %v4457_v11 = vld [vmem:[#allocation8] sm:$0xff] }
 0x116   : > { %v1667_v21 = vadd.f32 %v1666_v20, %v1654_v12  ;;  %v909_v20 = vperm.slane %v5231_v7, 6 }
 0x117   : > { %2690 = vmatpush.bf16.msrb.mxu2 %v4382_v42 }
 0x118   : > { %v1777_v26 = vmax.f32 %v1667_v21, 0.0  ;;  %v1655_v27 = vpop.f32.mrf.mxu2  ;;  %v4385_v21 = vld [vmem:[#allocation7 + $0xc0] sm:$0xff] }
 0x119   : > { %2666 = vmatpush.bf16.msra.mxu0 %v4364_v9  ;;  %2678 = vmatpush.bf16.msrb.mxu1 %v4373_v23 }
 0x11a   : > { %v1785_v28 = vpack.c.bf16 %v1777_v26, %v1777_v26 }
 0x11b   : > { %2691 = vmatpush.bf16.msrb.mxu2 %v4381_v8 }
 0x11c   : > { %2413 = vmatmul.bf16.vlgmr.msra.gmra.mxu3 %v1785_v28 }
 0x11d   : > { %2667 = vmatpush.bf16.msra.mxu0 %v4363_v19  ;;  %v1668_v35 = vpop.f32.mrf.mxu3  ;;  %2679 = vmatpush.bf16.msrb.mxu1 %v4372_v31  ;;  %v735_v19 = vadd.f32 %v5160_v46, %v661_v18  ;;  %v910_v31 = vperm.slane %v5231_v7, 7  ;;  %v663_v7 = vperm.slane %v5350_v56, 3 }
 0x11e   : > { %2701 = vmatpush.bf16.msra.mxu3 %v4392_v48 }
 0x11f   : > { %2692 = vmatpush.bf16.msrb.mxu2 %v4380_v55  ;;  %v765_v23 = vmax.f32 %v735_v19, 0.0  ;;  %v761_v45 = vadd.f32 %v5223_v5, %v663_v7  ;;  %v4475_v7 = vld [vmem:[#allocation11 + $0x10] sm:$0xff] }
 0x121   : > { %2668 = vmatpush.bf16.msra.mxu0 %v4362_v25  ;;  %2680 = vmatpush.bf16.msrb.mxu1 %v4371_v37  ;;  %v769_v27 = vpack.c.bf16 %v765_v23, %v765_v23  ;;  %v748_v37 = vadd.f32 %v5182_v53, %v662_v34 }
 0x122   : > { %2702 = vmatpush.bf16.msra.mxu3 %v4391_v52 }
 0x123   : > { %2693 = vmatpush.bf16.msrb.mxu2 %v4379_v63 }
 0x125   : > { %2669 = vmatpush.bf16.msra.mxu0 %v4361_v33  ;;  %v1679_v43 = vpop.f32.mrf.mxu0  ;;  %2681 = vmatpush.bf16.msrb.mxu1 %v4370_v41  ;;  %v766_v41 = vmax.f32 %v748_v37, 0.0 }
 0x126   : > { %v1680_v44 = vadd.f32 %v1679_v43, %v907_v39  ;;  %2703 = vmatpush.bf16.msra.mxu3 %v4390_v60 }
 0x127   : > { %v1692_v47 = vpop.f32.mrf.mxu1  ;;  %2694 = vmatpush.bf16.msrb.mxu2 %v4378_v4  ;;  %v4459_v4 = vld [vmem:[#allocation8 + $0x10] sm:$0xff] }
 0x128   : > { %v1693_v49 = vadd.f32 %v1692_v47, %v1680_v44  ;;  %v770_v44 = vpack.c.bf16 %v766_v41, %v766_v41  ;;  %v4479_v41 = vld [vmem:[#allocation11 + $0x30] sm:$0xff] }
 0x129   : > { %2682 = vmatpush.bf16.msrb.mxu1 %v4369_v13  ;;  %v767_v13 = vmax.f32 %v761_v45, 0.0  ;;  %v4593_v45 = vld [vmem:[%s5438_s10] ss:$0 sm:$0xff] }
 0x12a   : > { %v1778_v51 = vmax.f32 %v1693_v49, 0.0  ;;  %2704 = vmatpush.bf16.msra.mxu3 %v4389_v1 }
 0x12b   : > { %2695 = vmatpush.bf16.msrb.mxu2 %v4377_v14  ;;  %v771_v47 = vpack.c.bf16 %v767_v13, %v767_v13 }
 0x12c   : > { %v1786_v54 = vpack.c.bf16 %v1778_v51, %v1778_v51 }
 0x12d   : > { %v1681_v57 = vpop.f32.mrf.mxu0 }
 0x12e   : > { %2426 = vmatmul.bf16.vlgmr.msrb.gmra.mxu0 %v1786_v54  ;;  %2705 = vmatpush.bf16.msra.mxu3 %v4388_v10 }
 0x12f   : > { %v1694_v59 = vpop.f32.mrf.mxu1 }
 0x130   : > { %v1705_v58 = vpop.f32.mrf.mxu2  ;;  %v4464_v59 = vld [vmem:[#allocation8 + $0x38] sm:$0xff] }
 0x131   : > { %v1706_v62 = vadd.f32 %v1705_v58, %v908_v30  ;;  %2789 = vmatpush.bf16.msrb.mxu0 %v4464_v59 }
 0x132   : > { %2706 = vmatpush.bf16.msra.mxu3 %v4387_v16 }
 0x135   : > { %v1718_v0 = vpop.f32.mrf.mxu3  ;;  %2790 = vmatpush.bf16.msrb.mxu0 %v4463_v61 }
 0x136   : > { %v1719_v3 = vadd.f32 %v1718_v0, %v1706_v62  ;;  %2707 = vmatpush.bf16.msra.mxu3 %v4386_v50  ;;  %v4462_v62 = vld [vmem:[#allocation8 + $0x28] sm:$0xff]  ;;  %v4461_v0 = vld [vmem:[#allocation8 + $0x20] sm:$0xff] }
 0x137   : > { %v4470_v50 = vld [vmem:[#allocation10 + $0x28] sm:$0xff] }
 0x138   : > { %v1779_v6 = vmax.f32 %v1719_v3, 0.0  ;;  %v1707_v9 = vpop.f32.mrf.mxu2 }
 0x139   : > { %2791 = vmatpush.bf16.msrb.mxu0 %v4462_v62 }
 0x13a   : > { %v1787_v12 = vpack.c.bf16 %v1779_v6, %v1779_v6  ;;  %2708 = vmatpush.bf16.msra.mxu3 %v4385_v21  ;;  %v4458_v6 = vld [vmem:[#allocation8 + $0x8] sm:$0xff] }
 0x13c   : > { %2439 = vmatmul.bf16.vlgmr.msra.gmra.mxu1 %v1787_v12  ;;  %v4472_v12 = vld [vmem:[#allocation10 + $0x38] sm:$0xff] }
 0x13d   : > { %v1720_v15 = vpop.f32.mrf.mxu3  ;;  %2792 = vmatpush.bf16.msrb.mxu0 %v4461_v0  ;;  %2873 = vmatpush.bf16.msra.mxu1 %v4472_v12 }
 0x13e   : > { %2670 = vmatmul.bf16.vlgmr.msra.gmra.mxu0 %v768_v17  ;;  %v4471_v15 = vld [vmem:[#allocation10 + $0x30] sm:$0xff] }
 0x141   : > { %2793 = vmatpush.bf16.msrb.mxu0 %v4460_v2  ;;  %2874 = vmatpush.bf16.msra.mxu1 %v4471_v15 }
 0x145   : > { %v1731_v22 = vpop.f32.mrf.mxu0  ;;  %2794 = vmatpush.bf16.msrb.mxu0 %v4459_v4  ;;  %2875 = vmatpush.bf16.msra.mxu1 %v4470_v50 }
 0x146   : > { %v1732_v24 = vadd.f32 %v1731_v22, %v909_v20  ;;  %v4469_v22 = vld [vmem:[#allocation10 + $0x20] sm:$0xff] }
 0x147   : > { %v1744_v25 = vpop.f32.mrf.mxu1 }
 0x148   : > { %v1745_v26 = vadd.f32 %v1744_v25, %v1732_v24  ;;  %v4468_v25 = vld [vmem:[#allocation10 + $0x18] sm:$0xff] }
 0x149   : > { %2795 = vmatpush.bf16.msrb.mxu0 %v4458_v6  ;;  %2876 = vmatpush.bf16.msra.mxu1 %v4469_v22 }
 0x14a   : > { %v1780_v28 = vmax.f32 %v1745_v26, 0.0 }
 0x14c   : > { %v1788_v29 = vpack.c.bf16 %v1780_v28, %v1780_v28  ;;  %2683 = vmatmul.bf16.vlgmr.msrb.gmra.mxu1 %v769_v27  ;;  %v4467_v28 = vld [vmem:[#allocation10 + $0x10] sm:$0xff] }
 0x14d   : > { %v1733_v32 = vpop.f32.mrf.mxu0  ;;  %2796 = vmatpush.bf16.msrb.mxu0 %v4457_v11  ;;  %2877 = vmatpush.bf16.msra.mxu1 %v4468_v25 }
 0x14e   : > { %v1757_v33 = vpop.f32.mrf.mxu2  ;;  %2452 = vmatmul.bf16.vlgmr.msra.gmra.mxu2 %v1788_v29  ;;  %v4592_v32 = vld [vmem:[%s5436_s8] ss:$0 sm:$0xff] }
 0x14f   : > { %v1746_v46 = vpop.f32.mrf.mxu1  ;;  %v1758_v35 = vadd.f32 %v1757_v33, %v910_v31 }
 0x151   : > { %2878 = vmatpush.bf16.msra.mxu1 %v4467_v28 }
 0x155   : > { %v1770_v36 = vpop.f32.mrf.mxu3 }
 0x156   : > { %v1771_v38 = vadd.f32 %v1770_v36, %v1758_v35  ;;  %v1759_v40 = vpop.f32.mrf.mxu2 }
 0x157   : > { %v4480_v40 = vld [vmem:[#allocation11 + $0x38] sm:$0xff] }
 0x158   : > { %v1781_v39 = vmax.f32 %v1771_v38, 0.0  ;;  %v4466_v38 = vld [vmem:[#allocation10 + $0x8] sm:$0xff]  ;;  %2956 = vmatpush.bf16.msra.mxu2 %v4480_v40 }
 0x159   : > { %2879 = vmatpush.bf16.msra.mxu1 %v4466_v38 }
 0x15a   : > { %v1789_v42 = vpack.c.bf16 %v1781_v39, %v1781_v39  ;;  %v4465_v39 = vld [vmem:[#allocation10] sm:$0xff] }
 0x15c   : > { %2465 = vmatmul.bf16.vlgmr.msrb.gmra.mxu3 %v1789_v42  ;;  %2957 = vmatpush.bf16.msra.mxu2 %v4479_v41  ;;  %v4478_v42 = vld [vmem:[#allocation11 + $0x28] sm:$0xff] }
 0x15d   : > { %v1772_v43 = vpop.f32.mrf.mxu3  ;;  %2880 = vmatpush.bf16.msra.mxu1 %v4465_v39 }
 0x15e   : > { %2696 = vmatmul.bf16.vlgmr.msrb.gmra.mxu2 %v770_v44  ;;  %v4477_v43 = vld [vmem:[#allocation11 + $0x20] sm:$0xff]  ;;  %v4476_v44 = vld [vmem:[#allocation11 + $0x18] sm:$0xff] }
 0x160   : > { %2958 = vmatpush.bf16.msra.mxu2 %v4478_v42 }
 0x164   : > { %2959 = vmatpush.bf16.msra.mxu2 %v4477_v43 }
 0x168   : > { %2960 = vmatpush.bf16.msra.mxu2 %v4476_v44 }
 0x16b   : > { %v2375_v48 = vpop.f32.mrf.mxu0 }
 0x16c   : > { %2709 = vmatmul.bf16.vlgmr.msra.gmra.mxu3 %v771_v47  ;;  %2961 = vmatpush.bf16.msra.mxu2 %v4475_v7 }
 0x173   : > { %v2377_v8 = vpop.f32.mrf.mxu0 }
 0x179   : > { %v2388_v49 = vpop.f32.mrf.mxu1 }
 0x17a   : > { %v2389_v53 = vadd.f32 %v2388_v49, %v2375_v48 }
 0x181   : > { %v2390_v51 = vpop.f32.mrf.mxu1 }
 0x182   : > { %v4473_v51 = vld [vmem:[#allocation11] sm:$0xff] }
 0x191   : > { %v2401_v52 = vpop.f32.mrf.mxu2 }
 0x192   : > { %v2402_v54 = vadd.f32 %v2401_v52, %v2389_v53  ;;  %v4474_v53 = vld [vmem:[#allocation11 + $0x8] sm:$0xff]  ;;  %v4594_v52 = vld [vmem:[%s5440_s12] ss:$0 sm:$0xff] }
 0x193   : > { %2962 = vmatpush.bf16.msra.mxu2 %v4474_v53 }
 0x197   : > { %2963 = vmatpush.bf16.msra.mxu2 %v4473_v51 }
 0x199   : > { %v2403_v30 = vpop.f32.mrf.mxu2 }
 0x19f   : > { %v2414_v55 = vpop.f32.mrf.mxu3 }
 0x1a0   : > { %v2415_v14 = vadd.f32 %v2414_v55, %v2402_v54 }
 0x1a7   : > { %v2416_v57 = vpop.f32.mrf.mxu3 }
 0x1ab   : > { %v2427_v58 = vpop.f32.mrf.mxu0 }
 0x1ac   : > { %v2428_v17 = vadd.f32 %v2427_v58, %v2415_v14 }
 0x1b3   : > { %v2429_v56 = vpop.f32.mrf.mxu0 }
 0x1b9   : > { %v2440_v60 = vpop.f32.mrf.mxu1 }
 0x1ba   : > { %v2441_v18 = vadd.f32 %v2440_v60, %v2428_v17 }
 0x1bb   : > { %v2671_v5 = vpop.f32.mrf.mxu0 }
 0x1c1   : > { %v2442_v63 = vpop.f32.mrf.mxu1 }
 0x1c3   : > { %v2673_v1 = vpop.f32.mrf.mxu0 }
 0x1c9   : > { %v2684_v3 = vpop.f32.mrf.mxu1 }
 0x1d1   : > { %v2453_v9 = vpop.f32.mrf.mxu2  ;;  %v2686_v10 = vpop.f32.mrf.mxu1 }
 0x1d2   : > { %v2454_v20 = vadd.f32 %v2453_v9, %v2441_v18 }
 0x1d9   : > { %v2455_v16 = vpop.f32.mrf.mxu2 }
 0x1df   : > { %v2466_v19 = vpop.f32.mrf.mxu3 }
 0x1e0   : > { %v2467_v21 = vadd.f32 %v2466_v19, %v2454_v20 }
 0x1e1   : > { %v2697_v23 = vpop.f32.mrf.mxu2 }
 0x1e2   : > { %v2672_v24 = vadd.f32 %v2671_v5, %v2467_v21 }
 0x1e4   : > { %v2685_v27 = vadd.f32 %v2684_v3, %v2672_v24 }
 0x1e6   : > { %v2698_v31 = vadd.f32 %v2697_v23, %v2685_v27 }
 0x1e7   : > { %v2468_v26 = vpop.f32.mrf.mxu3 }
 0x1e9   : > { %v2699_v29 = vpop.f32.mrf.mxu2 }
 0x1ef   : > { %v2710_v33 = vpop.f32.mrf.mxu3 }
 0x1f0   : > { %v2711_v46 = vadd.f32 %v2710_v33, %v2698_v31 }
 0x1f2   : > { %v2718_v34 = vadd.f32 %v4592_v32, %v2711_v46 }
 0x1f4   : > { %v2719_v35 = vmax.f32 %v2718_v34, 0.0 }
 0x1f6   : > { %v2720_v36 = vpack.c.bf16 %v2719_v35, %v2719_v35 }
 0x1f7   : > { %v2712_v37 = vpop.f32.mrf.mxu3 }
 0x1f8   : > { %2797 = vmatmul.bf16.vlgmr.msrb.gmra.mxu0 %v2720_v36 }
 0x275   : > { %v2798_v13 = vpop.f32.mrf.mxu0 }
 0x276   : > { %v2799_v47 = vadd.f32 %v4593_v45, %v2798_v13 }
 0x278   : > { %2802 = vst [vmem:[%s631_s27] sm:$0xff] %v2799_v47  ;;  %v2803_v48 = vmax.f32 %v2799_v47, 0.0 }
 0x27a   : > { %v2804_v49 = vpack.c.bf16 %v2803_v48, %v2803_v48 }
 0x27c   : > { %2881 = vmatmul.bf16.vlgmr.msra.gmra.mxu1 %v2804_v49 }
 0x27d   : > { %v2800_v8 = vpop.f32.mrf.mxu0 }
 0x2f9   : > { %v2882_v54 = vpop.f32.mrf.mxu1 }
 0x2fa   : > { %v2883_v30 = vadd.f32 %v4594_v52, %v2882_v54 }
 0x2fc   : > { %v2886_v55 = vmax.f32 %v2883_v30, 0.0 }
 0x2fe   : > { %v2887_v57 = vpack.c.bf16 %v2886_v55, %v2886_v55 }
 0x300   : > { %2964 = vmatmul.bf16.vlgmr.msra.gmra.mxu2 %v2887_v57 }
 0x301   : > { %v2884_v58 = vpop.f32.mrf.mxu1 }
 0x302   : > { %4803 = shalt.err (!%p4800_p8)
}
 0x303   : > { %4505 = dma.vmem_to_hbm [thread:$0]  (%p5023_p5), %s2989_s18, 128, %s2991_s23, %s2971_s29  }
 0x304   : > { %s5477_s9 = sld [smem:[#allocation35_spill]]  ;;  %s638_s4 = scalar_lea.vmem [#allocation14], %s3185_s17 }
 0x305   : > { %s5478_s21 = sld [smem:[#allocation33_spill]]  ;;  %s3002_s19 = sshll.u32 %s638_s4, 4  ;;  %s3003_s19 = int_to_ptr.vmem [resolvable:$true] %s3002_s19 }
 0x306   : > { %s2976_s25 = scalar_lea.sflag [#allocation15], %s5366_s20 }
 0x30a   : > { %s3000_s2 = scalar_lea.hbm %s5477_s9, %s4220_s14  ;;  %s4824_s28 = scalar_lea.hbm %s5477_s9, 16 }
 0x30b   : > { %v4595_v59 = vld [vmem:[%s5478_s21] ss:$0 sm:$0xff]  ;;  %s3004_s24 = sshll.u32 %s3000_s2, 4  ;;  %s3005_s24 = int_to_ptr.hbm [resolvable:$true] %s3004_s24 }
 0x30c   : > { %s4818_s18 = sshra.s32 %s3005_s24, 4  ;;  %s4819_s18 = int_to_ptr.hbm [resolvable:$true] %s4818_s18 }
 0x30d   : > { %s4820_s23 = scalar_lea.hbm %s4819_s18, 8  ;;  %p4825_p12 = scmp.lt.s32.totalorder %s4819_s18, %s5477_s9 }
 0x30e   : > { %p4821_p9 = scmp.ne.s32.totalorder %s4819_s18, %s4820_s23  ;;  %p4826_p13 = scmp.lt.s32.totalorder %s4824_s28, %s4820_s23 }
 0x310   : > { %p4822_p10 = pnand %p4821_p9, %p5023_p5  ;;  %p4827_p0 = por %p4826_p13, %p4825_p12 }
 0x312   : > { %p4823_p11 = pneg %p4822_p10 }
 0x314   : > { %p4828_p1 = pnand %p4827_p0, %p4823_p11 }
 0x383   : > { %v2965_v56 = vpop.f32.mrf.mxu2 }
 0x384   : > { %v2966_v60 = vadd.f32 %v4595_v59, %v2965_v56 }
 0x386   : > { %2969 = vst [vmem:[%s638_s4] sm:$0xff] %v2966_v60 }
 0x387   : > { %4831 = shalt.err (!%p4828_p1)
}
 0x388   : > { %4506 = dma.vmem_to_hbm [thread:$0]  (%p5023_p5), %s3003_s19, 128, %s3005_s24, %s2976_s25  }
 0x38b   : > { %v2967_v61 = vpop.f32.mrf.mxu2 }
 0x38c PF: > { %s5479_s20 = sld [smem:[#allocation24_spill]] }
 0x38d   : > { %s5480_s27 = sld [smem:[#allocation22_spill]] }
 0x392   : > { %p4547_p2 = scmp.ge.s32.totalorder %s5479_s20, 2 }
 0x393   : > { %s3016_s2 = sand.u32 1, %s5480_s27  }
 0x394   : > { %p4529_p3 = pnand %p4547_p2, %p5027_p6  ;;  %s3017_s6 = scalar_lea.sflag [#allocation4], %s3016_s2 }
 0x396   : > { %p4530_p4 = pneg %p4529_p3 }
 0x398   : > { %4865 = dma.done.wait (%p4530_p4), %s3017_s6, 128  }
 0x399   : > { %4867 = vsyncadd (%p4530_p4), %s3017_s6, 4294967168  ;;  %s3027_s30 = scalar_lea.sflag [#allocation15], %s3016_s2 }
 0x39a   : > { %4869 = dma.done.wait (%p4530_p4), %s3027_s30, 128  }
 0x39b   : > { %4871 = vsyncadd (%p4530_p4), %s3027_s30, 4294967168  ;;  %s5482_s24 = sld [smem:[#allocation25_spill]]  ;;  %s5485_s21 = smov %s4878_s22 }
 0x39c   : > { %s5483_s0 = sld [smem:[#allocation23_spill]] }
 0x39d   : > { %s5484_s23 = sld [smem:[#allocation26_spill]] }
 0x3a1   : > { %p34_p5 = scmp.ge.s32.totalorder %s5482_s24, 4  }
 0x3a2   : > { %s5486_s22 = smov %s5483_s0 }
 0x3a3   :  { %36 = sbr.rel (!%p34_p5) target bundleno = 18 (0x12), region = 160 }
 0x3a8   :  { %3033 = vsyncpa [#allocation3], 1 }
 0x3a9   :  { %3035 = vsyncpa [#allocation3 + $0x1], 1 }
 0x3aa   :  { %3036 = vsyncpa [#allocation6], 1 }
 0x3ab   :  { %3037 = vsyncpa [#allocation9], 1 }
 0x3ac   :  { %3038 = vsyncpa [#allocation12], 1 }
 0x3ad   :  { %3039 = vsyncpa [#allocation4], 1 }
 0x3ae   :  { %3041 = vsyncpa [#allocation4 + $0x1], 1 }
 0x3af   :  { %3042 = vsyncpa [#allocation15], 1 }
 0x3b0   :  { %3044 = vsyncpa [#allocation15 + $0x1], 1 }

</bundles_post_ra>
